<compile_context>
chip_gen: v6e
topology: v6e:2x2x1
jax: 0.10.0
libtpu: 0.0.40
codegen_flags: <defaults>
</compile_context>

<pallas_src>
import functools

import jax
import jax.numpy as jnp
from jax import lax
from jax.experimental import pallas as pl
from jax.experimental.pallas import tpu as pltpu

C_PAD = 128  # lane-dense width for the classifier output


# ---------------------------------------------------------------------------
# fused kernel
# ---------------------------------------------------------------------------

def _layernorm(x, gamma, beta, eps=1e-5):
    mu = jnp.mean(x, axis=-1, keepdims=True)
    xc = x - mu
    var = jnp.mean(xc * xc, axis=-1, keepdims=True)
    return xc * lax.rsqrt(var + eps) * gamma + beta


def fused_forward_kernel(
        x_ref, pos_ref, emb_w_ref, emb_b_ref,
        wq_ref, bq_ref, wk_ref, bk_ref, wv_ref, bv_ref,
        wo_ref, bo_ref, w1_ref, b1_ref, w2_ref, b2_ref,
        g1_ref, be1_ref, g2_ref, be2_ref,
        head_w_ref, head_b_ref,
        o_ref,
        *, B, T, num_heads, num_layers):
    E = emb_w_ref.shape[1]
    H = num_heads
    Dh = E // H
    N = B * T

    # ---- embedding + (pre-tiled) positional embedding --------------------
    h = jnp.dot(x_ref[...], emb_w_ref[...],
                preferred_element_type=jnp.float32)
    h = h + emb_b_ref[...] + pos_ref[...]                    # (N, E) f32

    # ---- transformer encoder layers (post-norm, ReLU, eval mode) ---------
    for l in range(num_layers):                              # static unroll
        hb = h.astype(jnp.bfloat16)

        # QKV projections (1/sqrt(Dh) already folded into wq/bq)
        q = (jnp.dot(hb, wq_ref[l], preferred_element_type=jnp.float32)
             + bq_ref[l]).reshape(B, T, E)
        k = (jnp.dot(hb, wk_ref[l], preferred_element_type=jnp.float32)
             + bk_ref[l]).reshape(B, T, E)
        v = (jnp.dot(hb, wv_ref[l], preferred_element_type=jnp.float32)
             + bv_ref[l]).reshape(B, T, E)

        # fold heads into the leading batch axis: (H*B, T, Dh)
        qs = jnp.concatenate([q[:, :, i * Dh:(i + 1) * Dh] for i in range(H)], 0)
        ks = jnp.concatenate([k[:, :, i * Dh:(i + 1) * Dh] for i in range(H)], 0)
        vs = jnp.concatenate([v[:, :, i * Dh:(i + 1) * Dh] for i in range(H)], 0)

        s = jnp.einsum('gqd,gkd->gqk',
                       qs.astype(jnp.bfloat16), ks.astype(jnp.bfloat16),
                       preferred_element_type=jnp.float32)
        s = s - jnp.max(s, axis=-1, keepdims=True)
        p = jnp.exp(s)
        p = p * pl.reciprocal(jnp.sum(p, axis=-1, keepdims=True), approx=True)
        ctx = jnp.einsum('gqk,gkd->gqd',
                         p.astype(jnp.bfloat16), vs.astype(jnp.bfloat16),
                         preferred_element_type=jnp.float32)

        # un-stack heads back onto the lane axis, then output projection
        attn = jnp.concatenate([ctx[i * B:(i + 1) * B] for i in range(H)], -1)
        attn = attn.reshape(N, E)
        attn = jnp.dot(attn.astype(jnp.bfloat16), wo_ref[l],
                       preferred_element_type=jnp.float32) + bo_ref[l]

        # residual + norm1
        h1 = _layernorm(h + attn, g1_ref[l], be1_ref[l])

        # feed-forward (ReLU)
        ff = jnp.dot(h1.astype(jnp.bfloat16), w1_ref[l],
                     preferred_element_type=jnp.float32) + b1_ref[l]
        ff = jnp.maximum(ff, 0.0)
        ff = jnp.dot(ff.astype(jnp.bfloat16), w2_ref[l],
                     preferred_element_type=jnp.float32) + b2_ref[l]

        # residual + norm2
        h = _layernorm(h1 + ff, g2_ref[l], be2_ref[l])

    # ---- mean pool over sequence + classification head (lane-padded) -----
    pooled = jnp.sum(h.reshape(B, T, E), axis=1) * (1.0 / T)  # (B, E)
    o_ref[...] = (jnp.dot(pooled, head_w_ref[...],
                          preferred_element_type=jnp.float32)
                  + head_b_ref[...])


# ---------------------------------------------------------------------------
# wrapper
# ---------------------------------------------------------------------------

def prepare_kernel_params(params, *, num_heads):
    """Pre-transpose / split / scale-fold / stack / bf16-cast weights once."""
    E = params["emb_w"].shape[0]
    Dh = E // num_heads
    scale = 1.0 / (Dh ** 0.5)
    bf16 = jnp.bfloat16

    def stack(fn):
        return jnp.stack([fn(lp) for lp in params["layers"]])

    kp = {
        "emb_w": params["emb_w"].T,                               # (D, E) f32
        "emb_b": params["emb_b"].reshape(1, E),
        "pos":   params["pos"],                                   # (S, E)
        # attention: split packed in_w, pre-transpose, fold scale into Q
        "wq": stack(lambda lp: (lp["in_w"][0 * E:1 * E] * scale).T).astype(bf16),
        "bq": stack(lambda lp: (lp["in_b"][0 * E:1 * E] * scale).reshape(1, E)),
        "wk": stack(lambda lp: lp["in_w"][1 * E:2 * E].T).astype(bf16),
        "bk": stack(lambda lp: lp["in_b"][1 * E:2 * E].reshape(1, E)),
        "wv": stack(lambda lp: lp["in_w"][2 * E:3 * E].T).astype(bf16),
        "bv": stack(lambda lp: lp["in_b"][2 * E:3 * E].reshape(1, E)),
        "wo": stack(lambda lp: lp["out_w"].T).astype(bf16),
        "bo": stack(lambda lp: lp["out_b"].reshape(1, E)),
        # FFN
        "w1": stack(lambda lp: lp["w1"].T).astype(bf16),
        "b1": stack(lambda lp: lp["b1"].reshape(1, -1)),
        "w2": stack(lambda lp: lp["w2"].T).astype(bf16),
        "b2": stack(lambda lp: lp["b2"].reshape(1, E)),
        # LayerNorms (kept f32)
        "g1":  stack(lambda lp: lp["g1"].reshape(1, E)),
        "be1": stack(lambda lp: lp["be1"].reshape(1, E)),
        "g2":  stack(lambda lp: lp["g2"].reshape(1, E)),
        "be2": stack(lambda lp: lp["be2"].reshape(1, E)),
    }
    C = params["head_w"].shape[0]
    kp["head_w"] = jnp.pad(params["head_w"].T, ((0, 0), (0, C_PAD - C)))   # (E, 128)
    kp["head_b"] = jnp.pad(params["head_b"], (0, C_PAD - C)).reshape(1, C_PAD)
    kp["num_classes"] = C
    kp["num_layers"] = len(params["layers"])
    return kp


def imu_transformer_forward(x, kp, *, num_heads):
    B, T, D = x.shape
    E = kp["emb_w"].shape[1]
    L = kp["num_layers"]
    C = kp["num_classes"]
    assert T <= kp["pos"].shape[0], "sequence length exceeds positional table"
    assert E % num_heads == 0

    x2d = x.reshape(B * T, D)
    # positional rows arange(T), tiled once per batch element on the host/XLA side
    pos_tiled = jnp.tile(kp["pos"][:T], (B, 1))                  # (B*T, E)

    def vmem():
        return pl.BlockSpec(memory_space=pltpu.MemorySpace.VMEM)

    out = pl.pallas_call(
        functools.partial(fused_forward_kernel, B=B, T=T,
                          num_heads=num_heads, num_layers=L),
        out_shape=jax.ShapeDtypeStruct((B, C_PAD), jnp.float32),
        in_specs=[vmem() for _ in range(22)],
        out_specs=vmem(),
    )(x2d, pos_tiled, kp["emb_w"], kp["emb_b"],
      kp["wq"], kp["bq"], kp["wk"], kp["bk"], kp["wv"], kp["bv"],
      kp["wo"], kp["bo"], kp["w1"], kp["b1"], kp["w2"], kp["b2"],
      kp["g1"], kp["be1"], kp["g2"], kp["be2"],
      kp["head_w"], kp["head_b"])
    return out[:, :C]


# ---------------------------------------------------------------------------
# deterministic parameter construction (PyTorch-style layout)
# ---------------------------------------------------------------------------

def make_params(key, *, input_dim, embed_dim, seq_length, num_layers,
                num_classes, ff_dim):
    def nrm(k, shape, scale=0.02):
        return (scale * jax.random.normal(k, shape)).astype(jnp.float32)

    keys = jax.random.split(key, 4 + num_layers)
    params = {
        "emb_w": nrm(keys[0], (embed_dim, input_dim)),
        "emb_b": jnp.zeros((embed_dim,), jnp.float32),
        "pos":   nrm(keys[1], (seq_length, embed_dim)),
        "head_w": nrm(keys[2], (num_classes, embed_dim)),
        "head_b": jnp.zeros((num_classes,), jnp.float32),
        "layers": [],
    }
    for li in range(num_layers):
        lk = jax.random.split(keys[4 + li], 6)
        params["layers"].append({
            "in_w": nrm(lk[0], (3 * embed_dim, embed_dim)),
            "in_b": jnp.zeros((3 * embed_dim,), jnp.float32),
            "out_w": nrm(lk[1], (embed_dim, embed_dim)),
            "out_b": jnp.zeros((embed_dim,), jnp.float32),
            "w1": nrm(lk[2], (ff_dim, embed_dim)),
            "b1": jnp.zeros((ff_dim,), jnp.float32),
            "w2": nrm(lk[3], (embed_dim, ff_dim)),
            "b2": jnp.zeros((embed_dim,), jnp.float32),
            "g1": jnp.ones((embed_dim,), jnp.float32),
            "be1": jnp.zeros((embed_dim,), jnp.float32),
            "g2": jnp.ones((embed_dim,), jnp.float32),
            "be2": jnp.zeros((embed_dim,), jnp.float32),
        })
    return params


# ---------------------------------------------------------------------------
# main
# ---------------------------------------------------------------------------

if __name__ == "__main__":
    B, T = 2, 8
    INPUT_DIM, EMBED_DIM, SEQ_LEN = 3, 32, 16
    NUM_HEADS, NUM_LAYERS, NUM_CLASSES = 4, 2, 5
    FF_DIM = EMBED_DIM * 4

    key = jax.random.PRNGKey(0)
    kx, kparam = jax.random.split(key)
    x = jax.random.normal(kx, (B, T, INPUT_DIM), dtype=jnp.float32)

    params = make_params(kparam, input_dim=INPUT_DIM, embed_dim=EMBED_DIM,
                         seq_length=SEQ_LEN, num_layers=NUM_LAYERS,
                         num_classes=NUM_CLASSES, ff_dim=FF_DIM)
    kparams = prepare_kernel_params(params, num_heads=NUM_HEADS)

    out = imu_transformer_forward(x, kparams, num_heads=NUM_HEADS)
    out = jax.block_until_ready(out)
    assert out.shape == (B, NUM_CLASSES)
    assert bool(jnp.all(jnp.isfinite(out)))
    print("KERNEL_OK")
</pallas_src>

<mosaic_0001>
module attributes {stable_mosaic.version = 11 : i64} {
  func.func @fused_forward_kernel(%arg0: memref<16x3xf32, #tpu.memory_space<vmem>>, %arg1: memref<16x32xf32, #tpu.memory_space<vmem>>, %arg2: memref<3x32xf32, #tpu.memory_space<vmem>>, %arg3: memref<1x32xf32, #tpu.memory_space<vmem>>, %arg4: memref<2x32x32xbf16, #tpu.memory_space<vmem>>, %arg5: memref<2x1x32xf32, #tpu.memory_space<vmem>>, %arg6: memref<2x32x32xbf16, #tpu.memory_space<vmem>>, %arg7: memref<2x1x32xf32, #tpu.memory_space<vmem>>, %arg8: memref<2x32x32xbf16, #tpu.memory_space<vmem>>, %arg9: memref<2x1x32xf32, #tpu.memory_space<vmem>>, %arg10: memref<2x32x32xbf16, #tpu.memory_space<vmem>>, %arg11: memref<2x1x32xf32, #tpu.memory_space<vmem>>, %arg12: memref<2x32x128xbf16, #tpu.memory_space<vmem>>, %arg13: memref<2x1x128xf32, #tpu.memory_space<vmem>>, %arg14: memref<2x128x32xbf16, #tpu.memory_space<vmem>>, %arg15: memref<2x1x32xf32, #tpu.memory_space<vmem>>, %arg16: memref<2x1x32xf32, #tpu.memory_space<vmem>>, %arg17: memref<2x1x32xf32, #tpu.memory_space<vmem>>, %arg18: memref<2x1x32xf32, #tpu.memory_space<vmem>>, %arg19: memref<2x1x32xf32, #tpu.memory_space<vmem>>, %arg20: memref<32x128xf32, #tpu.memory_space<vmem>>, %arg21: memref<1x128xf32, #tpu.memory_space<vmem>>, %arg22: memref<2x128xf32, #tpu.memory_space<vmem>>) attributes {dimension_semantics = [], scalar_prefetch = 0 : i64, scratch_operands = 0 : i64, tpu.core_type = #tpu.core_type<tc>} {
    %c0 = arith.constant 0 : index
    %c0_0 = arith.constant 0 : index
    %0 = vector.load %arg0[%c0, %c0_0] : memref<16x3xf32, #tpu.memory_space<vmem>>, vector<16x3xf32>
    %c0_1 = arith.constant 0 : index
    %c0_2 = arith.constant 0 : index
    %1 = vector.load %arg2[%c0_1, %c0_2] : memref<3x32xf32, #tpu.memory_space<vmem>>, vector<3x32xf32>
    %cst = arith.constant dense<0.000000e+00> : vector<16x32xf32>
    %2 = tpu.matmul %0, %1, %cst {dimension_numbers = #tpu.dot_dimension_numbers<[1], [0], [0], [1], [0, 0, 1, 1], [], []>} : vector<16x3xf32>, vector<3x32xf32>, vector<16x32xf32> -> vector<16x32xf32>
    %c0_3 = arith.constant 0 : index
    %c0_4 = arith.constant 0 : index
    %3 = vector.load %arg3[%c0_3, %c0_4] : memref<1x32xf32, #tpu.memory_space<vmem>>, vector<1x32xf32>
    %4 = vector.broadcast %3 : vector<1x32xf32> to vector<16x32xf32>
    %5 = arith.addf %2, %4 : vector<16x32xf32>
    %c0_5 = arith.constant 0 : index
    %c0_6 = arith.constant 0 : index
    %6 = vector.load %arg1[%c0_5, %c0_6] : memref<16x32xf32, #tpu.memory_space<vmem>>, vector<16x32xf32>
    %7 = arith.addf %5, %6 : vector<16x32xf32>
    %8 = arith.truncf %7 : vector<16x32xf32> to vector<16x32xbf16>
    %c0_7 = arith.constant 0 : index
    %c0_8 = arith.constant 0 : index
    %c0_9 = arith.constant 0 : index
    %9 = vector.load %arg4[%c0_7, %c0_8, %c0_9] : memref<2x32x32xbf16, #tpu.memory_space<vmem>>, vector<1x32x32xbf16>
    %10 = vector.shape_cast %9 : vector<1x32x32xbf16> to vector<32x32xbf16>
    %cst_10 = arith.constant dense<0.000000e+00> : vector<16x32xf32>
    %11 = tpu.matmul %8, %10, %cst_10 {dimension_numbers = #tpu.dot_dimension_numbers<[1], [0], [0], [1], [0, 0, 1, 1], [], []>} : vector<16x32xbf16>, vector<32x32xbf16>, vector<16x32xf32> -> vector<16x32xf32>
    %c0_11 = arith.constant 0 : index
    %c0_12 = arith.constant 0 : index
    %c0_13 = arith.constant 0 : index
    %12 = vector.load %arg5[%c0_11, %c0_12, %c0_13] : memref<2x1x32xf32, #tpu.memory_space<vmem>>, vector<1x1x32xf32>
    %13 = vector.shape_cast %12 : vector<1x1x32xf32> to vector<1x32xf32>
    %14 = vector.broadcast %13 : vector<1x32xf32> to vector<16x32xf32>
    %15 = arith.addf %11, %14 : vector<16x32xf32>
    %16 = vector.shape_cast %15 : vector<16x32xf32> to vector<2x8x32xf32>
    %c0_14 = arith.constant 0 : index
    %c0_15 = arith.constant 0 : index
    %c0_16 = arith.constant 0 : index
    %17 = vector.load %arg6[%c0_14, %c0_15, %c0_16] : memref<2x32x32xbf16, #tpu.memory_space<vmem>>, vector<1x32x32xbf16>
    %18 = vector.shape_cast %17 : vector<1x32x32xbf16> to vector<32x32xbf16>
    %cst_17 = arith.constant dense<0.000000e+00> : vector<16x32xf32>
    %19 = tpu.matmul %8, %18, %cst_17 {dimension_numbers = #tpu.dot_dimension_numbers<[1], [0], [0], [1], [0, 0, 1, 1], [], []>} : vector<16x32xbf16>, vector<32x32xbf16>, vector<16x32xf32> -> vector<16x32xf32>
    %c0_18 = arith.constant 0 : index
    %c0_19 = arith.constant 0 : index
    %c0_20 = arith.constant 0 : index
    %20 = vector.load %arg7[%c0_18, %c0_19, %c0_20] : memref<2x1x32xf32, #tpu.memory_space<vmem>>, vector<1x1x32xf32>
    %21 = vector.shape_cast %20 : vector<1x1x32xf32> to vector<1x32xf32>
    %22 = vector.broadcast %21 : vector<1x32xf32> to vector<16x32xf32>
    %23 = arith.addf %19, %22 : vector<16x32xf32>
    %24 = vector.shape_cast %23 : vector<16x32xf32> to vector<2x8x32xf32>
    %c0_21 = arith.constant 0 : index
    %c0_22 = arith.constant 0 : index
    %c0_23 = arith.constant 0 : index
    %25 = vector.load %arg8[%c0_21, %c0_22, %c0_23] : memref<2x32x32xbf16, #tpu.memory_space<vmem>>, vector<1x32x32xbf16>
    %26 = vector.shape_cast %25 : vector<1x32x32xbf16> to vector<32x32xbf16>
    %cst_24 = arith.constant dense<0.000000e+00> : vector<16x32xf32>
    %27 = tpu.matmul %8, %26, %cst_24 {dimension_numbers = #tpu.dot_dimension_numbers<[1], [0], [0], [1], [0, 0, 1, 1], [], []>} : vector<16x32xbf16>, vector<32x32xbf16>, vector<16x32xf32> -> vector<16x32xf32>
    %c0_25 = arith.constant 0 : index
    %c0_26 = arith.constant 0 : index
    %c0_27 = arith.constant 0 : index
    %28 = vector.load %arg9[%c0_25, %c0_26, %c0_27] : memref<2x1x32xf32, #tpu.memory_space<vmem>>, vector<1x1x32xf32>
    %29 = vector.shape_cast %28 : vector<1x1x32xf32> to vector<1x32xf32>
    %30 = vector.broadcast %29 : vector<1x32xf32> to vector<16x32xf32>
    %31 = arith.addf %27, %30 : vector<16x32xf32>
    %32 = vector.shape_cast %31 : vector<16x32xf32> to vector<2x8x32xf32>
    %33 = vector.extract_strided_slice %16 {offsets = [0, 0, 0], sizes = [2, 8, 8], strides = [1, 1, 1]} : vector<2x8x32xf32> to vector<2x8x8xf32>
    %34 = vector.extract_strided_slice %16 {offsets = [0, 0, 8], sizes = [2, 8, 8], strides = [1, 1, 1]} : vector<2x8x32xf32> to vector<2x8x8xf32>
    %35 = vector.extract_strided_slice %16 {offsets = [0, 0, 16], sizes = [2, 8, 8], strides = [1, 1, 1]} : vector<2x8x32xf32> to vector<2x8x8xf32>
    %36 = vector.extract_strided_slice %16 {offsets = [0, 0, 24], sizes = [2, 8, 8], strides = [1, 1, 1]} : vector<2x8x32xf32> to vector<2x8x8xf32>
    %37 = tpu.concatenate %33, %34, %35, %36 in 0 : vector<2x8x8xf32>, vector<2x8x8xf32>, vector<2x8x8xf32>, vector<2x8x8xf32> -> vector<8x8x8xf32>
    %38 = vector.extract_strided_slice %24 {offsets = [0, 0, 0], sizes = [2, 8, 8], strides = [1, 1, 1]} : vector<2x8x32xf32> to vector<2x8x8xf32>
    %39 = vector.extract_strided_slice %24 {offsets = [0, 0, 8], sizes = [2, 8, 8], strides = [1, 1, 1]} : vector<2x8x32xf32> to vector<2x8x8xf32>
    %40 = vector.extract_strided_slice %24 {offsets = [0, 0, 16], sizes = [2, 8, 8], strides = [1, 1, 1]} : vector<2x8x32xf32> to vector<2x8x8xf32>
    %41 = vector.extract_strided_slice %24 {offsets = [0, 0, 24], sizes = [2, 8, 8], strides = [1, 1, 1]} : vector<2x8x32xf32> to vector<2x8x8xf32>
    %42 = tpu.concatenate %38, %39, %40, %41 in 0 : vector<2x8x8xf32>, vector<2x8x8xf32>, vector<2x8x8xf32>, vector<2x8x8xf32> -> vector<8x8x8xf32>
    %43 = vector.extract_strided_slice %32 {offsets = [0, 0, 0], sizes = [2, 8, 8], strides = [1, 1, 1]} : vector<2x8x32xf32> to vector<2x8x8xf32>
    %44 = vector.extract_strided_slice %32 {offsets = [0, 0, 8], sizes = [2, 8, 8], strides = [1, 1, 1]} : vector<2x8x32xf32> to vector<2x8x8xf32>
    %45 = vector.extract_strided_slice %32 {offsets = [0, 0, 16], sizes = [2, 8, 8], strides = [1, 1, 1]} : vector<2x8x32xf32> to vector<2x8x8xf32>
    %46 = vector.extract_strided_slice %32 {offsets = [0, 0, 24], sizes = [2, 8, 8], strides = [1, 1, 1]} : vector<2x8x32xf32> to vector<2x8x8xf32>
    %47 = tpu.concatenate %43, %44, %45, %46 in 0 : vector<2x8x8xf32>, vector<2x8x8xf32>, vector<2x8x8xf32>, vector<2x8x8xf32> -> vector<8x8x8xf32>
    %48 = arith.truncf %37 : vector<8x8x8xf32> to vector<8x8x8xbf16>
    %49 = arith.truncf %42 : vector<8x8x8xf32> to vector<8x8x8xbf16>
    "tpu.trace_start"() <{level = 10 : i32, message = "gqd,gkd->gqk"}> : () -> ()
    %cst_28 = arith.constant dense<0.000000e+00> : vector<8x8x8xf32>
    %50 = tpu.matmul %48, %49, %cst_28 {dimension_numbers = #tpu.dot_dimension_numbers<[2], [2], [1], [1], [0, 0, 0, 1, 1, 1], [0], [0]>} : vector<8x8x8xbf16>, vector<8x8x8xbf16>, vector<8x8x8xf32> -> vector<8x8x8xf32>
    "tpu.trace_stop"() : () -> ()
    %cst_29 = arith.constant dense<0xFF800000> : vector<8x8xf32>
    %51 = vector.multi_reduction <maximumf>, %50, %cst_29 [2] : vector<8x8x8xf32> to vector<8x8xf32>
    %52 = vector.shape_cast %51 : vector<8x8xf32> to vector<8x8x1xf32>
    %53 = vector.broadcast %52 : vector<8x8x1xf32> to vector<8x8x8xf32>
    %54 = arith.subf %50, %53 : vector<8x8x8xf32>
    %55 = math.exp %54 : vector<8x8x8xf32>
    %cst_30 = arith.constant dense<0.000000e+00> : vector<8x8xf32>
    %56 = vector.multi_reduction <add>, %55, %cst_30 [2] : vector<8x8x8xf32> to vector<8x8xf32>
    %57 = vector.shape_cast %56 : vector<8x8xf32> to vector<8x8x1xf32>
    %58 = tpu.reciprocal %57 {approx = true} : vector<8x8x1xf32> -> vector<8x8x1xf32>
    %59 = vector.broadcast %58 : vector<8x8x1xf32> to vector<8x8x8xf32>
    %60 = arith.mulf %55, %59 : vector<8x8x8xf32>
    %61 = arith.truncf %60 : vector<8x8x8xf32> to vector<8x8x8xbf16>
    %62 = arith.truncf %47 : vector<8x8x8xf32> to vector<8x8x8xbf16>
    "tpu.trace_start"() <{level = 10 : i32, message = "gqk,gkd->gqd"}> : () -> ()
    %cst_31 = arith.constant dense<0.000000e+00> : vector<8x8x8xf32>
    %63 = tpu.matmul %61, %62, %cst_31 {dimension_numbers = #tpu.dot_dimension_numbers<[2], [1], [1], [2], [0, 0, 0, 1, 1, 2], [0], [0]>} : vector<8x8x8xbf16>, vector<8x8x8xbf16>, vector<8x8x8xf32> -> vector<8x8x8xf32>
    "tpu.trace_stop"() : () -> ()
    %64 = vector.extract_strided_slice %63 {offsets = [0, 0, 0], sizes = [2, 8, 8], strides = [1, 1, 1]} : vector<8x8x8xf32> to vector<2x8x8xf32>
    %65 = vector.extract_strided_slice %63 {offsets = [2, 0, 0], sizes = [2, 8, 8], strides = [1, 1, 1]} : vector<8x8x8xf32> to vector<2x8x8xf32>
    %66 = vector.extract_strided_slice %63 {offsets = [4, 0, 0], sizes = [2, 8, 8], strides = [1, 1, 1]} : vector<8x8x8xf32> to vector<2x8x8xf32>
    %67 = vector.extract_strided_slice %63 {offsets = [6, 0, 0], sizes = [2, 8, 8], strides = [1, 1, 1]} : vector<8x8x8xf32> to vector<2x8x8xf32>
    %68 = tpu.concatenate %64, %65, %66, %67 in 2 : vector<2x8x8xf32>, vector<2x8x8xf32>, vector<2x8x8xf32>, vector<2x8x8xf32> -> vector<2x8x32xf32>
    %69 = vector.shape_cast %68 : vector<2x8x32xf32> to vector<16x32xf32>
    %70 = arith.truncf %69 : vector<16x32xf32> to vector<16x32xbf16>
    %c0_32 = arith.constant 0 : index
    %c0_33 = arith.constant 0 : index
    %c0_34 = arith.constant 0 : index
    %71 = vector.load %arg10[%c0_32, %c0_33, %c0_34] : memref<2x32x32xbf16, #tpu.memory_space<vmem>>, vector<1x32x32xbf16>
    %72 = vector.shape_cast %71 : vector<1x32x32xbf16> to vector<32x32xbf16>
    %cst_35 = arith.constant dense<0.000000e+00> : vector<16x32xf32>
    %73 = tpu.matmul %70, %72, %cst_35 {dimension_numbers = #tpu.dot_dimension_numbers<[1], [0], [0], [1], [0, 0, 1, 1], [], []>} : vector<16x32xbf16>, vector<32x32xbf16>, vector<16x32xf32> -> vector<16x32xf32>
    %c0_36 = arith.constant 0 : index
    %c0_37 = arith.constant 0 : index
    %c0_38 = arith.constant 0 : index
    %74 = vector.load %arg11[%c0_36, %c0_37, %c0_38] : memref<2x1x32xf32, #tpu.memory_space<vmem>>, vector<1x1x32xf32>
    %75 = vector.shape_cast %74 : vector<1x1x32xf32> to vector<1x32xf32>
    %76 = vector.broadcast %75 : vector<1x32xf32> to vector<16x32xf32>
    %77 = arith.addf %73, %76 : vector<16x32xf32>
    %78 = arith.addf %7, %77 : vector<16x32xf32>
    %c0_39 = arith.constant 0 : index
    %c0_40 = arith.constant 0 : index
    %c0_41 = arith.constant 0 : index
    %79 = vector.load %arg16[%c0_39, %c0_40, %c0_41] : memref<2x1x32xf32, #tpu.memory_space<vmem>>, vector<1x1x32xf32>
    %80 = vector.shape_cast %79 : vector<1x1x32xf32> to vector<1x32xf32>
    %c0_42 = arith.constant 0 : index
    %c0_43 = arith.constant 0 : index
    %c0_44 = arith.constant 0 : index
    %81 = vector.load %arg17[%c0_42, %c0_43, %c0_44] : memref<2x1x32xf32, #tpu.memory_space<vmem>>, vector<1x1x32xf32>
    %82 = vector.shape_cast %81 : vector<1x1x32xf32> to vector<1x32xf32>
    %cst_45 = arith.constant dense<0.000000e+00> : vector<16xf32>
    %83 = vector.multi_reduction <add>, %78, %cst_45 [1] : vector<16x32xf32> to vector<16xf32>
    %84 = vector.shape_cast %83 : vector<16xf32> to vector<16x1xf32>
    %cst_46 = arith.constant 3.200000e+01 : f32
    %85 = vector.broadcast %cst_46 : f32 to vector<16x1xf32>
    %86 = arith.divf %84, %85 : vector<16x1xf32>
    %87 = vector.broadcast %86 : vector<16x1xf32> to vector<16x32xf32>
    %88 = arith.subf %78, %87 : vector<16x32xf32>
    %89 = arith.mulf %88, %88 : vector<16x32xf32>
    %cst_47 = arith.constant dense<0.000000e+00> : vector<16xf32>
    %90 = vector.multi_reduction <add>, %89, %cst_47 [1] : vector<16x32xf32> to vector<16xf32>
    %91 = vector.shape_cast %90 : vector<16xf32> to vector<16x1xf32>
    %cst_48 = arith.constant 3.200000e+01 : f32
    %92 = vector.broadcast %cst_48 : f32 to vector<16x1xf32>
    %93 = arith.divf %91, %92 : vector<16x1xf32>
    %cst_49 = arith.constant 9.99999974E-6 : f32
    %94 = vector.broadcast %cst_49 : f32 to vector<16x1xf32>
    %95 = arith.addf %93, %94 : vector<16x1xf32>
    %96 = math.rsqrt %95 : vector<16x1xf32>
    %97 = vector.broadcast %96 : vector<16x1xf32> to vector<16x32xf32>
    %98 = arith.mulf %88, %97 : vector<16x32xf32>
    %99 = vector.broadcast %80 : vector<1x32xf32> to vector<16x32xf32>
    %100 = arith.mulf %98, %99 : vector<16x32xf32>
    %101 = vector.broadcast %82 : vector<1x32xf32> to vector<16x32xf32>
    %102 = arith.addf %100, %101 : vector<16x32xf32>
    %103 = arith.truncf %102 : vector<16x32xf32> to vector<16x32xbf16>
    %c0_50 = arith.constant 0 : index
    %c0_51 = arith.constant 0 : index
    %c0_52 = arith.constant 0 : index
    %104 = vector.load %arg12[%c0_50, %c0_51, %c0_52] : memref<2x32x128xbf16, #tpu.memory_space<vmem>>, vector<1x32x128xbf16>
    %105 = vector.shape_cast %104 : vector<1x32x128xbf16> to vector<32x128xbf16>
    %cst_53 = arith.constant dense<0.000000e+00> : vector<16x128xf32>
    %106 = tpu.matmul %103, %105, %cst_53 {dimension_numbers = #tpu.dot_dimension_numbers<[1], [0], [0], [1], [0, 0, 1, 1], [], []>} : vector<16x32xbf16>, vector<32x128xbf16>, vector<16x128xf32> -> vector<16x128xf32>
    %c0_54 = arith.constant 0 : index
    %c0_55 = arith.constant 0 : index
    %c0_56 = arith.constant 0 : index
    %107 = vector.load %arg13[%c0_54, %c0_55, %c0_56] : memref<2x1x128xf32, #tpu.memory_space<vmem>>, vector<1x1x128xf32>
    %108 = vector.shape_cast %107 : vector<1x1x128xf32> to vector<1x128xf32>
    %109 = vector.broadcast %108 : vector<1x128xf32> to vector<16x128xf32>
    %110 = arith.addf %106, %109 : vector<16x128xf32>
    %cst_57 = arith.constant 0.000000e+00 : f32
    %111 = vector.broadcast %cst_57 : f32 to vector<16x128xf32>
    %112 = arith.maximumf %110, %111 : vector<16x128xf32>
    %113 = arith.truncf %112 : vector<16x128xf32> to vector<16x128xbf16>
    %c0_58 = arith.constant 0 : index
    %c0_59 = arith.constant 0 : index
    %c0_60 = arith.constant 0 : index
    %114 = vector.load %arg14[%c0_58, %c0_59, %c0_60] : memref<2x128x32xbf16, #tpu.memory_space<vmem>>, vector<1x128x32xbf16>
    %115 = vector.shape_cast %114 : vector<1x128x32xbf16> to vector<128x32xbf16>
    %cst_61 = arith.constant dense<0.000000e+00> : vector<16x32xf32>
    %116 = tpu.matmul %113, %115, %cst_61 {dimension_numbers = #tpu.dot_dimension_numbers<[1], [0], [0], [1], [0, 0, 1, 1], [], []>} : vector<16x128xbf16>, vector<128x32xbf16>, vector<16x32xf32> -> vector<16x32xf32>
    %c0_62 = arith.constant 0 : index
    %c0_63 = arith.constant 0 : index
    %c0_64 = arith.constant 0 : index
    %117 = vector.load %arg15[%c0_62, %c0_63, %c0_64] : memref<2x1x32xf32, #tpu.memory_space<vmem>>, vector<1x1x32xf32>
    %118 = vector.shape_cast %117 : vector<1x1x32xf32> to vector<1x32xf32>
    %119 = vector.broadcast %118 : vector<1x32xf32> to vector<16x32xf32>
    %120 = arith.addf %116, %119 : vector<16x32xf32>
    %121 = arith.addf %102, %120 : vector<16x32xf32>
    %c0_65 = arith.constant 0 : index
    %c0_66 = arith.constant 0 : index
    %c0_67 = arith.constant 0 : index
    %122 = vector.load %arg18[%c0_65, %c0_66, %c0_67] : memref<2x1x32xf32, #tpu.memory_space<vmem>>, vector<1x1x32xf32>
    %123 = vector.shape_cast %122 : vector<1x1x32xf32> to vector<1x32xf32>
    %c0_68 = arith.constant 0 : index
    %c0_69 = arith.constant 0 : index
    %c0_70 = arith.constant 0 : index
    %124 = vector.load %arg19[%c0_68, %c0_69, %c0_70] : memref<2x1x32xf32, #tpu.memory_space<vmem>>, vector<1x1x32xf32>
    %125 = vector.shape_cast %124 : vector<1x1x32xf32> to vector<1x32xf32>
    %cst_71 = arith.constant dense<0.000000e+00> : vector<16xf32>
    %126 = vector.multi_reduction <add>, %121, %cst_71 [1] : vector<16x32xf32> to vector<16xf32>
    %127 = vector.shape_cast %126 : vector<16xf32> to vector<16x1xf32>
    %cst_72 = arith.constant 3.200000e+01 : f32
    %128 = vector.broadcast %cst_72 : f32 to vector<16x1xf32>
    %129 = arith.divf %127, %128 : vector<16x1xf32>
    %130 = vector.broadcast %129 : vector<16x1xf32> to vector<16x32xf32>
    %131 = arith.subf %121, %130 : vector<16x32xf32>
    %132 = arith.mulf %131, %131 : vector<16x32xf32>
    %cst_73 = arith.constant dense<0.000000e+00> : vector<16xf32>
    %133 = vector.multi_reduction <add>, %132, %cst_73 [1] : vector<16x32xf32> to vector<16xf32>
    %134 = vector.shape_cast %133 : vector<16xf32> to vector<16x1xf32>
    %cst_74 = arith.constant 3.200000e+01 : f32
    %135 = vector.broadcast %cst_74 : f32 to vector<16x1xf32>
    %136 = arith.divf %134, %135 : vector<16x1xf32>
    %cst_75 = arith.constant 9.99999974E-6 : f32
    %137 = vector.broadcast %cst_75 : f32 to vector<16x1xf32>
    %138 = arith.addf %136, %137 : vector<16x1xf32>
    %139 = math.rsqrt %138 : vector<16x1xf32>
    %140 = vector.broadcast %139 : vector<16x1xf32> to vector<16x32xf32>
    %141 = arith.mulf %131, %140 : vector<16x32xf32>
    %142 = vector.broadcast %123 : vector<1x32xf32> to vector<16x32xf32>
    %143 = arith.mulf %141, %142 : vector<16x32xf32>
    %144 = vector.broadcast %125 : vector<1x32xf32> to vector<16x32xf32>
    %145 = arith.addf %143, %144 : vector<16x32xf32>
    %146 = arith.truncf %145 : vector<16x32xf32> to vector<16x32xbf16>
    %c1 = arith.constant 1 : index
    %c0_76 = arith.constant 0 : index
    %c0_77 = arith.constant 0 : index
    %147 = vector.load %arg4[%c1, %c0_76, %c0_77] : memref<2x32x32xbf16, #tpu.memory_space<vmem>>, vector<1x32x32xbf16>
    %148 = vector.shape_cast %147 : vector<1x32x32xbf16> to vector<32x32xbf16>
    %cst_78 = arith.constant dense<0.000000e+00> : vector<16x32xf32>
    %149 = tpu.matmul %146, %148, %cst_78 {dimension_numbers = #tpu.dot_dimension_numbers<[1], [0], [0], [1], [0, 0, 1, 1], [], []>} : vector<16x32xbf16>, vector<32x32xbf16>, vector<16x32xf32> -> vector<16x32xf32>
    %c1_79 = arith.constant 1 : index
    %c0_80 = arith.constant 0 : index
    %c0_81 = arith.constant 0 : index
    %150 = vector.load %arg5[%c1_79, %c0_80, %c0_81] : memref<2x1x32xf32, #tpu.memory_space<vmem>>, vector<1x1x32xf32>
    %151 = vector.shape_cast %150 : vector<1x1x32xf32> to vector<1x32xf32>
    %152 = vector.broadcast %151 : vector<1x32xf32> to vector<16x32xf32>
    %153 = arith.addf %149, %152 : vector<16x32xf32>
    %154 = vector.shape_cast %153 : vector<16x32xf32> to vector<2x8x32xf32>
    %c1_82 = arith.constant 1 : index
    %c0_83 = arith.constant 0 : index
    %c0_84 = arith.constant 0 : index
    %155 = vector.load %arg6[%c1_82, %c0_83, %c0_84] : memref<2x32x32xbf16, #tpu.memory_space<vmem>>, vector<1x32x32xbf16>
    %156 = vector.shape_cast %155 : vector<1x32x32xbf16> to vector<32x32xbf16>
    %cst_85 = arith.constant dense<0.000000e+00> : vector<16x32xf32>
    %157 = tpu.matmul %146, %156, %cst_85 {dimension_numbers = #tpu.dot_dimension_numbers<[1], [0], [0], [1], [0, 0, 1, 1], [], []>} : vector<16x32xbf16>, vector<32x32xbf16>, vector<16x32xf32> -> vector<16x32xf32>
    %c1_86 = arith.constant 1 : index
    %c0_87 = arith.constant 0 : index
    %c0_88 = arith.constant 0 : index
    %158 = vector.load %arg7[%c1_86, %c0_87, %c0_88] : memref<2x1x32xf32, #tpu.memory_space<vmem>>, vector<1x1x32xf32>
    %159 = vector.shape_cast %158 : vector<1x1x32xf32> to vector<1x32xf32>
    %160 = vector.broadcast %159 : vector<1x32xf32> to vector<16x32xf32>
    %161 = arith.addf %157, %160 : vector<16x32xf32>
    %162 = vector.shape_cast %161 : vector<16x32xf32> to vector<2x8x32xf32>
    %c1_89 = arith.constant 1 : index
    %c0_90 = arith.constant 0 : index
    %c0_91 = arith.constant 0 : index
    %163 = vector.load %arg8[%c1_89, %c0_90, %c0_91] : memref<2x32x32xbf16, #tpu.memory_space<vmem>>, vector<1x32x32xbf16>
    %164 = vector.shape_cast %163 : vector<1x32x32xbf16> to vector<32x32xbf16>
    %cst_92 = arith.constant dense<0.000000e+00> : vector<16x32xf32>
    %165 = tpu.matmul %146, %164, %cst_92 {dimension_numbers = #tpu.dot_dimension_numbers<[1], [0], [0], [1], [0, 0, 1, 1], [], []>} : vector<16x32xbf16>, vector<32x32xbf16>, vector<16x32xf32> -> vector<16x32xf32>
    %c1_93 = arith.constant 1 : index
    %c0_94 = arith.constant 0 : index
    %c0_95 = arith.constant 0 : index
    %166 = vector.load %arg9[%c1_93, %c0_94, %c0_95] : memref<2x1x32xf32, #tpu.memory_space<vmem>>, vector<1x1x32xf32>
    %167 = vector.shape_cast %166 : vector<1x1x32xf32> to vector<1x32xf32>
    %168 = vector.broadcast %167 : vector<1x32xf32> to vector<16x32xf32>
    %169 = arith.addf %165, %168 : vector<16x32xf32>
    %170 = vector.shape_cast %169 : vector<16x32xf32> to vector<2x8x32xf32>
    %171 = vector.extract_strided_slice %154 {offsets = [0, 0, 0], sizes = [2, 8, 8], strides = [1, 1, 1]} : vector<2x8x32xf32> to vector<2x8x8xf32>
    %172 = vector.extract_strided_slice %154 {offsets = [0, 0, 8], sizes = [2, 8, 8], strides = [1, 1, 1]} : vector<2x8x32xf32> to vector<2x8x8xf32>
    %173 = vector.extract_strided_slice %154 {offsets = [0, 0, 16], sizes = [2, 8, 8], strides = [1, 1, 1]} : vector<2x8x32xf32> to vector<2x8x8xf32>
    %174 = vector.extract_strided_slice %154 {offsets = [0, 0, 24], sizes = [2, 8, 8], strides = [1, 1, 1]} : vector<2x8x32xf32> to vector<2x8x8xf32>
    %175 = tpu.concatenate %171, %172, %173, %174 in 0 : vector<2x8x8xf32>, vector<2x8x8xf32>, vector<2x8x8xf32>, vector<2x8x8xf32> -> vector<8x8x8xf32>
    %176 = vector.extract_strided_slice %162 {offsets = [0, 0, 0], sizes = [2, 8, 8], strides = [1, 1, 1]} : vector<2x8x32xf32> to vector<2x8x8xf32>
    %177 = vector.extract_strided_slice %162 {offsets = [0, 0, 8], sizes = [2, 8, 8], strides = [1, 1, 1]} : vector<2x8x32xf32> to vector<2x8x8xf32>
    %178 = vector.extract_strided_slice %162 {offsets = [0, 0, 16], sizes = [2, 8, 8], strides = [1, 1, 1]} : vector<2x8x32xf32> to vector<2x8x8xf32>
    %179 = vector.extract_strided_slice %162 {offsets = [0, 0, 24], sizes = [2, 8, 8], strides = [1, 1, 1]} : vector<2x8x32xf32> to vector<2x8x8xf32>
    %180 = tpu.concatenate %176, %177, %178, %179 in 0 : vector<2x8x8xf32>, vector<2x8x8xf32>, vector<2x8x8xf32>, vector<2x8x8xf32> -> vector<8x8x8xf32>
    %181 = vector.extract_strided_slice %170 {offsets = [0, 0, 0], sizes = [2, 8, 8], strides = [1, 1, 1]} : vector<2x8x32xf32> to vector<2x8x8xf32>
    %182 = vector.extract_strided_slice %170 {offsets = [0, 0, 8], sizes = [2, 8, 8], strides = [1, 1, 1]} : vector<2x8x32xf32> to vector<2x8x8xf32>
    %183 = vector.extract_strided_slice %170 {offsets = [0, 0, 16], sizes = [2, 8, 8], strides = [1, 1, 1]} : vector<2x8x32xf32> to vector<2x8x8xf32>
    %184 = vector.extract_strided_slice %170 {offsets = [0, 0, 24], sizes = [2, 8, 8], strides = [1, 1, 1]} : vector<2x8x32xf32> to vector<2x8x8xf32>
    %185 = tpu.concatenate %181, %182, %183, %184 in 0 : vector<2x8x8xf32>, vector<2x8x8xf32>, vector<2x8x8xf32>, vector<2x8x8xf32> -> vector<8x8x8xf32>
    %186 = arith.truncf %175 : vector<8x8x8xf32> to vector<8x8x8xbf16>
    %187 = arith.truncf %180 : vector<8x8x8xf32> to vector<8x8x8xbf16>
    "tpu.trace_start"() <{level = 10 : i32, message = "gqd,gkd->gqk"}> : () -> ()
    %cst_96 = arith.constant dense<0.000000e+00> : vector<8x8x8xf32>
    %188 = tpu.matmul %186, %187, %cst_96 {dimension_numbers = #tpu.dot_dimension_numbers<[2], [2], [1], [1], [0, 0, 0, 1, 1, 1], [0], [0]>} : vector<8x8x8xbf16>, vector<8x8x8xbf16>, vector<8x8x8xf32> -> vector<8x8x8xf32>
    "tpu.trace_stop"() : () -> ()
    %cst_97 = arith.constant dense<0xFF800000> : vector<8x8xf32>
    %189 = vector.multi_reduction <maximumf>, %188, %cst_97 [2] : vector<8x8x8xf32> to vector<8x8xf32>
    %190 = vector.shape_cast %189 : vector<8x8xf32> to vector<8x8x1xf32>
    %191 = vector.broadcast %190 : vector<8x8x1xf32> to vector<8x8x8xf32>
    %192 = arith.subf %188, %191 : vector<8x8x8xf32>
    %193 = math.exp %192 : vector<8x8x8xf32>
    %cst_98 = arith.constant dense<0.000000e+00> : vector<8x8xf32>
    %194 = vector.multi_reduction <add>, %193, %cst_98 [2] : vector<8x8x8xf32> to vector<8x8xf32>
    %195 = vector.shape_cast %194 : vector<8x8xf32> to vector<8x8x1xf32>
    %196 = tpu.reciprocal %195 {approx = true} : vector<8x8x1xf32> -> vector<8x8x1xf32>
    %197 = vector.broadcast %196 : vector<8x8x1xf32> to vector<8x8x8xf32>
    %198 = arith.mulf %193, %197 : vector<8x8x8xf32>
    %199 = arith.truncf %198 : vector<8x8x8xf32> to vector<8x8x8xbf16>
    %200 = arith.truncf %185 : vector<8x8x8xf32> to vector<8x8x8xbf16>
    "tpu.trace_start"() <{level = 10 : i32, message = "gqk,gkd->gqd"}> : () -> ()
    %cst_99 = arith.constant dense<0.000000e+00> : vector<8x8x8xf32>
    %201 = tpu.matmul %199, %200, %cst_99 {dimension_numbers = #tpu.dot_dimension_numbers<[2], [1], [1], [2], [0, 0, 0, 1, 1, 2], [0], [0]>} : vector<8x8x8xbf16>, vector<8x8x8xbf16>, vector<8x8x8xf32> -> vector<8x8x8xf32>
    "tpu.trace_stop"() : () -> ()
    %202 = vector.extract_strided_slice %201 {offsets = [0, 0, 0], sizes = [2, 8, 8], strides = [1, 1, 1]} : vector<8x8x8xf32> to vector<2x8x8xf32>
    %203 = vector.extract_strided_slice %201 {offsets = [2, 0, 0], sizes = [2, 8, 8], strides = [1, 1, 1]} : vector<8x8x8xf32> to vector<2x8x8xf32>
    %204 = vector.extract_strided_slice %201 {offsets = [4, 0, 0], sizes = [2, 8, 8], strides = [1, 1, 1]} : vector<8x8x8xf32> to vector<2x8x8xf32>
    %205 = vector.extract_strided_slice %201 {offsets = [6, 0, 0], sizes = [2, 8, 8], strides = [1, 1, 1]} : vector<8x8x8xf32> to vector<2x8x8xf32>
    %206 = tpu.concatenate %202, %203, %204, %205 in 2 : vector<2x8x8xf32>, vector<2x8x8xf32>, vector<2x8x8xf32>, vector<2x8x8xf32> -> vector<2x8x32xf32>
    %207 = vector.shape_cast %206 : vector<2x8x32xf32> to vector<16x32xf32>
    %208 = arith.truncf %207 : vector<16x32xf32> to vector<16x32xbf16>
    %c1_100 = arith.constant 1 : index
    %c0_101 = arith.constant 0 : index
    %c0_102 = arith.constant 0 : index
    %209 = vector.load %arg10[%c1_100, %c0_101, %c0_102] : memref<2x32x32xbf16, #tpu.memory_space<vmem>>, vector<1x32x32xbf16>
    %210 = vector.shape_cast %209 : vector<1x32x32xbf16> to vector<32x32xbf16>
    %cst_103 = arith.constant dense<0.000000e+00> : vector<16x32xf32>
    %211 = tpu.matmul %208, %210, %cst_103 {dimension_numbers = #tpu.dot_dimension_numbers<[1], [0], [0], [1], [0, 0, 1, 1], [], []>} : vector<16x32xbf16>, vector<32x32xbf16>, vector<16x32xf32> -> vector<16x32xf32>
    %c1_104 = arith.constant 1 : index
    %c0_105 = arith.constant 0 : index
    %c0_106 = arith.constant 0 : index
    %212 = vector.load %arg11[%c1_104, %c0_105, %c0_106] : memref<2x1x32xf32, #tpu.memory_space<vmem>>, vector<1x1x32xf32>
    %213 = vector.shape_cast %212 : vector<1x1x32xf32> to vector<1x32xf32>
    %214 = vector.broadcast %213 : vector<1x32xf32> to vector<16x32xf32>
    %215 = arith.addf %211, %214 : vector<16x32xf32>
    %216 = arith.addf %145, %215 : vector<16x32xf32>
    %c1_107 = arith.constant 1 : index
    %c0_108 = arith.constant 0 : index
    %c0_109 = arith.constant 0 : index
    %217 = vector.load %arg16[%c1_107, %c0_108, %c0_109] : memref<2x1x32xf32, #tpu.memory_space<vmem>>, vector<1x1x32xf32>
    %218 = vector.shape_cast %217 : vector<1x1x32xf32> to vector<1x32xf32>
    %c1_110 = arith.constant 1 : index
    %c0_111 = arith.constant 0 : index
    %c0_112 = arith.constant 0 : index
    %219 = vector.load %arg17[%c1_110, %c0_111, %c0_112] : memref<2x1x32xf32, #tpu.memory_space<vmem>>, vector<1x1x32xf32>
    %220 = vector.shape_cast %219 : vector<1x1x32xf32> to vector<1x32xf32>
    %cst_113 = arith.constant dense<0.000000e+00> : vector<16xf32>
    %221 = vector.multi_reduction <add>, %216, %cst_113 [1] : vector<16x32xf32> to vector<16xf32>
    %222 = vector.shape_cast %221 : vector<16xf32> to vector<16x1xf32>
    %cst_114 = arith.constant 3.200000e+01 : f32
    %223 = vector.broadcast %cst_114 : f32 to vector<16x1xf32>
    %224 = arith.divf %222, %223 : vector<16x1xf32>
    %225 = vector.broadcast %224 : vector<16x1xf32> to vector<16x32xf32>
    %226 = arith.subf %216, %225 : vector<16x32xf32>
    %227 = arith.mulf %226, %226 : vector<16x32xf32>
    %cst_115 = arith.constant dense<0.000000e+00> : vector<16xf32>
    %228 = vector.multi_reduction <add>, %227, %cst_115 [1] : vector<16x32xf32> to vector<16xf32>
    %229 = vector.shape_cast %228 : vector<16xf32> to vector<16x1xf32>
    %cst_116 = arith.constant 3.200000e+01 : f32
    %230 = vector.broadcast %cst_116 : f32 to vector<16x1xf32>
    %231 = arith.divf %229, %230 : vector<16x1xf32>
    %cst_117 = arith.constant 9.99999974E-6 : f32
    %232 = vector.broadcast %cst_117 : f32 to vector<16x1xf32>
    %233 = arith.addf %231, %232 : vector<16x1xf32>
    %234 = math.rsqrt %233 : vector<16x1xf32>
    %235 = vector.broadcast %234 : vector<16x1xf32> to vector<16x32xf32>
    %236 = arith.mulf %226, %235 : vector<16x32xf32>
    %237 = vector.broadcast %218 : vector<1x32xf32> to vector<16x32xf32>
    %238 = arith.mulf %236, %237 : vector<16x32xf32>
    %239 = vector.broadcast %220 : vector<1x32xf32> to vector<16x32xf32>
    %240 = arith.addf %238, %239 : vector<16x32xf32>
    %241 = arith.truncf %240 : vector<16x32xf32> to vector<16x32xbf16>
    %c1_118 = arith.constant 1 : index
    %c0_119 = arith.constant 0 : index
    %c0_120 = arith.constant 0 : index
    %242 = vector.load %arg12[%c1_118, %c0_119, %c0_120] : memref<2x32x128xbf16, #tpu.memory_space<vmem>>, vector<1x32x128xbf16>
    %243 = vector.shape_cast %242 : vector<1x32x128xbf16> to vector<32x128xbf16>
    %cst_121 = arith.constant dense<0.000000e+00> : vector<16x128xf32>
    %244 = tpu.matmul %241, %243, %cst_121 {dimension_numbers = #tpu.dot_dimension_numbers<[1], [0], [0], [1], [0, 0, 1, 1], [], []>} : vector<16x32xbf16>, vector<32x128xbf16>, vector<16x128xf32> -> vector<16x128xf32>
    %c1_122 = arith.constant 1 : index
    %c0_123 = arith.constant 0 : index
    %c0_124 = arith.constant 0 : index
    %245 = vector.load %arg13[%c1_122, %c0_123, %c0_124] : memref<2x1x128xf32, #tpu.memory_space<vmem>>, vector<1x1x128xf32>
    %246 = vector.shape_cast %245 : vector<1x1x128xf32> to vector<1x128xf32>
    %247 = vector.broadcast %246 : vector<1x128xf32> to vector<16x128xf32>
    %248 = arith.addf %244, %247 : vector<16x128xf32>
    %cst_125 = arith.constant 0.000000e+00 : f32
    %249 = vector.broadcast %cst_125 : f32 to vector<16x128xf32>
    %250 = arith.maximumf %248, %249 : vector<16x128xf32>
    %251 = arith.truncf %250 : vector<16x128xf32> to vector<16x128xbf16>
    %c1_126 = arith.constant 1 : index
    %c0_127 = arith.constant 0 : index
    %c0_128 = arith.constant 0 : index
    %252 = vector.load %arg14[%c1_126, %c0_127, %c0_128] : memref<2x128x32xbf16, #tpu.memory_space<vmem>>, vector<1x128x32xbf16>
    %253 = vector.shape_cast %252 : vector<1x128x32xbf16> to vector<128x32xbf16>
    %cst_129 = arith.constant dense<0.000000e+00> : vector<16x32xf32>
    %254 = tpu.matmul %251, %253, %cst_129 {dimension_numbers = #tpu.dot_dimension_numbers<[1], [0], [0], [1], [0, 0, 1, 1], [], []>} : vector<16x128xbf16>, vector<128x32xbf16>, vector<16x32xf32> -> vector<16x32xf32>
    %c1_130 = arith.constant 1 : index
    %c0_131 = arith.constant 0 : index
    %c0_132 = arith.constant 0 : index
    %255 = vector.load %arg15[%c1_130, %c0_131, %c0_132] : memref<2x1x32xf32, #tpu.memory_space<vmem>>, vector<1x1x32xf32>
    %256 = vector.shape_cast %255 : vector<1x1x32xf32> to vector<1x32xf32>
    %257 = vector.broadcast %256 : vector<1x32xf32> to vector<16x32xf32>
    %258 = arith.addf %254, %257 : vector<16x32xf32>
    %259 = arith.addf %240, %258 : vector<16x32xf32>
    %c1_133 = arith.constant 1 : index
    %c0_134 = arith.constant 0 : index
    %c0_135 = arith.constant 0 : index
    %260 = vector.load %arg18[%c1_133, %c0_134, %c0_135] : memref<2x1x32xf32, #tpu.memory_space<vmem>>, vector<1x1x32xf32>
    %261 = vector.shape_cast %260 : vector<1x1x32xf32> to vector<1x32xf32>
    %c1_136 = arith.constant 1 : index
    %c0_137 = arith.constant 0 : index
    %c0_138 = arith.constant 0 : index
    %262 = vector.load %arg19[%c1_136, %c0_137, %c0_138] : memref<2x1x32xf32, #tpu.memory_space<vmem>>, vector<1x1x32xf32>
    %263 = vector.shape_cast %262 : vector<1x1x32xf32> to vector<1x32xf32>
    %cst_139 = arith.constant dense<0.000000e+00> : vector<16xf32>
    %264 = vector.multi_reduction <add>, %259, %cst_139 [1] : vector<16x32xf32> to vector<16xf32>
    %265 = vector.shape_cast %264 : vector<16xf32> to vector<16x1xf32>
    %cst_140 = arith.constant 3.200000e+01 : f32
    %266 = vector.broadcast %cst_140 : f32 to vector<16x1xf32>
    %267 = arith.divf %265, %266 : vector<16x1xf32>
    %268 = vector.broadcast %267 : vector<16x1xf32> to vector<16x32xf32>
    %269 = arith.subf %259, %268 : vector<16x32xf32>
    %270 = arith.mulf %269, %269 : vector<16x32xf32>
    %cst_141 = arith.constant dense<0.000000e+00> : vector<16xf32>
    %271 = vector.multi_reduction <add>, %270, %cst_141 [1] : vector<16x32xf32> to vector<16xf32>
    %272 = vector.shape_cast %271 : vector<16xf32> to vector<16x1xf32>
    %cst_142 = arith.constant 3.200000e+01 : f32
    %273 = vector.broadcast %cst_142 : f32 to vector<16x1xf32>
    %274 = arith.divf %272, %273 : vector<16x1xf32>
    %cst_143 = arith.constant 9.99999974E-6 : f32
    %275 = vector.broadcast %cst_143 : f32 to vector<16x1xf32>
    %276 = arith.addf %274, %275 : vector<16x1xf32>
    %277 = math.rsqrt %276 : vector<16x1xf32>
    %278 = vector.broadcast %277 : vector<16x1xf32> to vector<16x32xf32>
    %279 = arith.mulf %269, %278 : vector<16x32xf32>
    %280 = vector.broadcast %261 : vector<1x32xf32> to vector<16x32xf32>
    %281 = arith.mulf %279, %280 : vector<16x32xf32>
    %282 = vector.broadcast %263 : vector<1x32xf32> to vector<16x32xf32>
    %283 = arith.addf %281, %282 : vector<16x32xf32>
    %284 = vector.shape_cast %283 : vector<16x32xf32> to vector<2x8x32xf32>
    %cst_144 = arith.constant dense<0.000000e+00> : vector<2x32xf32>
    %285 = vector.multi_reduction <add>, %284, %cst_144 [1] : vector<2x8x32xf32> to vector<2x32xf32>
    %cst_145 = arith.constant 1.250000e-01 : f32
    %286 = vector.broadcast %cst_145 : f32 to vector<2x32xf32>
    %287 = arith.mulf %285, %286 : vector<2x32xf32>
    %c0_146 = arith.constant 0 : index
    %c0_147 = arith.constant 0 : index
    %288 = vector.load %arg20[%c0_146, %c0_147] : memref<32x128xf32, #tpu.memory_space<vmem>>, vector<32x128xf32>
    %cst_148 = arith.constant dense<0.000000e+00> : vector<2x128xf32>
    %289 = tpu.matmul %287, %288, %cst_148 {dimension_numbers = #tpu.dot_dimension_numbers<[1], [0], [0], [1], [0, 0, 1, 1], [], []>} : vector<2x32xf32>, vector<32x128xf32>, vector<2x128xf32> -> vector<2x128xf32>
    %c0_149 = arith.constant 0 : index
    %c0_150 = arith.constant 0 : index
    %290 = vector.load %arg21[%c0_149, %c0_150] : memref<1x128xf32, #tpu.memory_space<vmem>>, vector<1x128xf32>
    %291 = vector.broadcast %290 : vector<1x128xf32> to vector<2x128xf32>
    %292 = arith.addf %289, %291 : vector<2x128xf32>
    %c0_151 = arith.constant 0 : index
    %c0_152 = arith.constant 0 : index
    %293 = vector.load %arg22[%c0_151, %c0_152] : memref<2x128xf32, #tpu.memory_space<vmem>>, vector<2x128xf32>
    tpu.vector_store %arg22[%c0_151, %c0_152], %292 {strides = array<i32>} : memref<2x128xf32, #tpu.memory_space<vmem>>, vector<2x128xf32>,
    return
  }
}

</mosaic_0001>

<bundles_post_ra>
// kernel: tpu_custom_call.1
= control target key start
LH: loop header
LB: loop body
LE: loop exit
PB: predicated region body
PF: predicated region fallthrough
CT: control target
= control target key end

     0   :  { %s5068_s0 = inlined_call_operand.vmem [shape: f32[16,3], index: 0, kind: input, shape index: {}]   ;;  %s5069_s1 = inlined_call_operand.hbm [shape: f32[16,32], index: 1, kind: input, shape index: {}]   ;;  %s5070_s2 = inlined_call_operand.hbm [shape: f32[3,32], index: 2, kind: input, shape index: {}]   ;;  %s5071_s3 = inlined_call_operand.hbm [shape: f32[1,32], index: 3, kind: input, shape index: {}]   ;;  %s5072_s4 = inlined_call_operand.vmem [shape: bf16[2,32,32], index: 4, kind: input, shape index: {}]   ;;  %s5073_s5 = inlined_call_operand.vmem [shape: f32[2,1,32], index: 5, kind: input, shape index: {}]   ;;  %s5074_s6 = inlined_call_operand.vmem [shape: bf16[2,32,32], index: 6, kind: input, shape index: {}]   ;;  %s5075_s7 = inlined_call_operand.hbm [shape: f32[2,1,32], index: 7, kind: input, shape index: {}]   ;;  %s5076_s8 = inlined_call_operand.vmem [shape: bf16[2,32,32], index: 8, kind: input, shape index: {}]   ;;  %s5077_s9 = inlined_call_operand.hbm [shape: f32[2,1,32], index: 9, kind: input, shape index: {}]   ;;  %s5078_s10 = inlined_call_operand.vmem [shape: bf16[2,32,32], index: 10, kind: input, shape index: {}]   ;;  %s5079_s11 = inlined_call_operand.vmem [shape: f32[2,1,32], index: 11, kind: input, shape index: {}]   ;;  %s5080_s12 = inlined_call_operand.vmem [shape: bf16[2,32,128], index: 12, kind: input, shape index: {}]   ;;  %s5081_s13 = inlined_call_operand.vmem [shape: f32[2,1,128], index: 13, kind: input, shape index: {}]   ;;  %s5082_s14 = inlined_call_operand.vmem [shape: bf16[2,128,32], index: 14, kind: input, shape index: {}]   ;;  %s5083_s15 = inlined_call_operand.vmem [shape: f32[2,1,32], index: 15, kind: input, shape index: {}]   ;;  %s5084_s16 = inlined_call_operand.vmem [shape: f32[2,1,32], index: 16, kind: input, shape index: {}]   ;;  %s5085_s17 = inlined_call_operand.vmem [shape: f32[2,1,32], index: 17, kind: input, shape index: {}]   ;;  %s5086_s18 = inlined_call_operand.vmem [shape: f32[2,1,32], index: 18, kind: input, shape index: {}]   ;;  %s5087_s19 = inlined_call_operand.vmem [shape: f32[2,1,32], index: 19, kind: input, shape index: {}]   ;;  %s5088_s20 = inlined_call_operand.vmem [shape: f32[32,128], index: 20, kind: input, shape index: {}]   ;;  %s5089_s21 = inlined_call_operand.vmem [shape: f32[1,128], index: 21, kind: input, shape index: {}]   ;;  %s5090_s22 = inlined_call_operand.hbm [shape: f32[2,128], index: 22, kind: output, shape index: {}]  }
   0x1   :  { %5097 = sst [smem:[#allocation16_spill]] %s5068_s0 }
   0x2   :  { %5098 = sst [smem:[#allocation17_spill]] %s5069_s1 }
   0x3   :  { %5099 = sst [smem:[#allocation18_spill]] %s5070_s2 }
   0x4   :  { %5100 = sst [smem:[#allocation19_spill]] %s5071_s3 }
   0x5   :  { %5101 = sst [smem:[#allocation20_spill]] %s5072_s4 }
   0x6   :  { %5102 = sst [smem:[#allocation21_spill]] %s5073_s5 }
   0x7   :  { %5103 = sst [smem:[#allocation22_spill]] %s5074_s6 }
   0x8   :  { %27 = vsyncpa [#allocation3], 0 }
   0x9   :  { %28 = vsyncpa [#allocation6], 0 }
   0xa   :  { %29 = vsyncpa [#allocation9], 0 }
   0xb   :  { %30 = vsyncpa [#allocation4], 0  ;;  %s4326_s3 = smov [#allocation5]   ;;  %s4327_s29 = smov [#allocation8]  }
   0xc   :  { %s51_s28 = sshll.u32 %s4326_s3, 4  ;;  %s76_s30 = sshll.u32 %s4327_s29, 4  ;;  %s52_s28 = int_to_ptr.vmem [resolvable:$true] %s51_s28  ;;  %s77_s30 = int_to_ptr.vmem [resolvable:$true] %s76_s30 }
   0xd   :  { %s4206_s4 = scalar_lea.vmem %s52_s28, 64  ;;  %p4211_p1 = scmp.lt.s32.totalorder %s52_s28, %s52_s28 }
   0xe   :  { %p4207_p0 = scmp.ne.s32.totalorder %s52_s28, %s4206_s4  ;;  %p4212_p2 = scmp.lt.s32.totalorder %s4206_s4, %s4206_s4 }
  0x10   :  { %p4213_p3 = por %p4212_p2, %p4211_p1 }
  0x12   :  { %p4214_p4 = pnand %p4213_p3, %p4207_p0 }
  0x14   :  { %4217 = shalt.err (!%p4214_p4)
}
  0x15   :  { %s5104_s1 = sld [smem:[#allocation18_spill]]  ;;  %s4226_s5 = scalar_lea.vmem %s77_s30, 32 }
  0x16   :  { %p4227_p5 = scmp.ne.s32.totalorder %s77_s30, %s4226_s5  ;;  %p4231_p6 = scmp.lt.s32.totalorder %s77_s30, %s77_s30 }
  0x17   :  { %p4232_p7 = scmp.lt.s32.totalorder %s4226_s5, %s4226_s5 }
  0x19   :  { %p4233_p8 = por %p4232_p7, %p4231_p6 }
  0x1b   :  { %54 = dma.hbm_to_vmem [thread:$0]  %s5104_s1, 64, %s52_s28, [#allocation6]  }
  0x1c   :  { %p4234_p9 = pnand %p4233_p8, %p4227_p5 }
  0x1e   :  { %4237 = shalt.err (!%p4234_p9)
}
  0x1f   :  { %s5095_s24 = smov 16   ;;  %s4329_s6 = smov 1  }
  0x20   :  { %82 = dma.hbm_to_vmem [thread:$0]  %s5075_s7, 32, %s77_s30, [#allocation9], %s5095_s24, %s5095_s24, %s4329_s6  }
  0x21   :  { %s4330_s2 = smov [#allocation2]  }
  0x22   :  { %s38_s27 = sshll.u32 %s4330_s2, 4  ;;  %s39_s27 = int_to_ptr.vmem [resolvable:$true] %s38_s27 }
  0x23   :  { %s4246_s3 = scalar_lea.vmem %s39_s27, 256  ;;  %p4251_p11 = scmp.lt.s32.totalorder %s39_s27, %s39_s27 }
  0x24   :  { %p4247_p10 = scmp.ne.s32.totalorder %s39_s27, %s4246_s3  ;;  %p4252_p12 = scmp.lt.s32.totalorder %s4246_s3, %s4246_s3 }
  0x26   :  { %p4253_p13 = por %p4252_p12, %p4251_p11 }
  0x28   :  { %p4254_p0 = pnand %p4253_p13, %p4247_p10 }
  0x2a   :  { %4257 = shalt.err (!%p4254_p0)
}
  0x2b   :  { %s4331_s28 = smov 128   ;;  %s4332_s29 = smov 8  }
  0x2c   :  { %s5105_s23 = sld [smem:[#allocation17_spill]]  ;;  %s4333_s1 = smov [#allocation7]  }
  0x2d   :  { %s61_s5 = sshll.u32 %s4333_s1, 4  ;;  %s4334_s7 = smov [#allocation10]   ;;  %s62_s5 = int_to_ptr.vmem [resolvable:$true] %s61_s5 }
  0x2e   :  { %s90_s30 = sshll.u32 %s4334_s7, 4  ;;  %s4266_s25 = scalar_lea.vmem %s62_s5, 16  ;;  %s91_s30 = int_to_ptr.vmem [resolvable:$true] %s90_s30 }
  0x2f   :  { %p4267_p1 = scmp.ne.s32.totalorder %s62_s5, %s4266_s25  ;;  %s4270_s26 = scalar_lea.vmem %s62_s5, 32 }
  0x30   :  { %p4271_p2 = scmp.lt.s32.totalorder %s62_s5, %s62_s5  ;;  %p4272_p3 = scmp.lt.s32.totalorder %s4270_s26, %s4266_s25 }
  0x32   :  { %44 = dma.hbm_to_vmem [thread:$0]  %s5105_s23, 256, %s39_s27, [#allocation3], %s4331_s28, %s4331_s28, %s4332_s29  }
  0x33   :  { %p4273_p4 = por %p4272_p3, %p4271_p2 }
  0x35   :  { %p4274_p5 = pnand %p4273_p4, %p4267_p1 }
  0x37   :  { %4277 = shalt.err (!%p4274_p5)
}
  0x38   :  { %s5106_s24 = sld [smem:[#allocation19_spill]]  ;;  %s4286_s4 = scalar_lea.vmem %s91_s30, 32 }
  0x39   :  { %p4287_p6 = scmp.ne.s32.totalorder %s91_s30, %s4286_s4  ;;  %p4291_p7 = scmp.lt.s32.totalorder %s91_s30, %s91_s30 }
  0x3a   :  { %p4292_p8 = scmp.lt.s32.totalorder %s4286_s4, %s4286_s4 }
  0x3c   :  { %p4293_p9 = por %p4292_p8, %p4291_p7 }
  0x3e   :  { %64 = dma.hbm_to_vmem [thread:$0]  %s5106_s24, 16, %s62_s5, [#allocation6]  }
  0x3f   :  { %p4294_p10 = pnand %p4293_p9, %p4287_p6 }
  0x41   :  { %4297 = shalt.err (!%p4294_p10)
}
  0x42   :  { %s5107_s27 = smov 16  }
  0x43   :  { %96 = dma.hbm_to_vmem [thread:$0]  %s5077_s9, 32, %s91_s30, [#allocation9], %s5107_s27, %s5107_s27, %s4329_s6  }
  0x44   :  { %4318 = dma.done.wait [#allocation3], 256  }
  0x45   :  { %4319 = vsyncadd [#allocation3], 4294967040 }
  0x46   :  { %4320 = dma.done.wait [#allocation6], 80  }
  0x47   :  { %4321 = vsyncadd [#allocation6], 4294967216 }
  0x48   :  { %4322 = dma.done.wait [#allocation9], 64  }
  0x49   :  { %4323 = vsyncadd [#allocation9], 4294967232  ;;  %vm154_vm0 = vcmask 1042432   ;;  %vm147_vm1 = vcmask 23552   ;;  %v139_v0 = vld [vmem:[#allocation5] sm:$0x7] }
  0x4a   :  { %s5108_s1 = sld [smem:[#allocation16_spill]]  ;;  %3618 = vmatprep.subr.msk.mxu1 %vm154_vm0, %v139_v0  ;;  %v4335_v4 = vmov 0.0   ;;  %vm4336_vm2 = vmmov 0   ;;  %v3350_v6 = vld [vmem:[#allocation7] ss:$0 sm:$0xff]  ;;  %v234_v9 = vld [vmem:[#allocation2 + $0x8] sm:$0xff] }
  0x4b   :  { %3619 = vmatpush3.msk.msra.mxu1 %vm154_vm0, %v139_v0  ;;  %s5109_s30 = sld [smem:[#allocation20_spill]]  ;;  %3623 = vmatprep.subr.bf16.mxu0 %v4335_v4  ;;  %v233_v11 = vld [vmem:[#allocation2] sm:$0xff]  ;;  %vm261_vm3 = vcmask 261120   ;;  %v4086_v18 = vld [vmem:[%s5076_s8 + $0x8] sm:$0xff]   ;;  %v3358_v24 = vld [vmem:[#allocation8] ss:$0 sm:$0xff] }
  0x4c   :  { %3653 = vmatprep.subr.bf16.mxu1 %v4335_v4  ;;  %3627 = vmatprep.mubr.msk.bf16.mxu0 %vm4336_vm2, %v4335_v4  ;;  %s5110_s4 = sld [smem:[#allocation22_spill]]  ;;  %v4087_v19 = vld [vmem:[%s5076_s8] sm:$0xff]   ;;  %vm510_vm4 = vcmask 64512   ;;  %s4337_s25 = smov 112   ;;  %v3362_v40 = vld [vmem:[#allocation10] ss:$0 sm:$0xff] }
  0x4d   :  { %s5111_s6 = sld [smem:[#allocation21_spill]]  ;;  %s4338_s26 = smov 120   ;;  %vm986_vm5 = vcmask 1043456   ;;  %vm1378_vm6 = vcmask 130048   ;;  %vm1381_vm7 = vcmask 195584   ;;  %vm3258_vm8 = vcmask 1041409  }
  0x4e   :  { %s4339_s2 = smov 104   ;;  %s4340_s23 = smov 24  }
  0x50   :  { %v137_v1 = vld [vmem:[%s5108_s1] sm:$0xff]  ;;  %v138_v2 = vld [vmem:[%s5108_s1 + $0x8] sm:$0xff] }
  0x51   :  { %3620 = vmatprep.mubr.msk.f32.mxu1 %vm147_vm1, %v137_v1  ;;  %v4082_v3 = vld [vmem:[%s5109_s30 + $0x8] sm:$0xff]   ;;  %v4083_v5 = vld [vmem:[%s5109_s30] sm:$0xff]  }
  0x52   :  { %3621 = vmatmul.mubr.msk.f32.vlgmr.msra.gmra.mxu1 %vm147_vm1, %v138_v2  ;;  %3624 = vmatpush3.bf16.msra.mxu0 %v4082_v3  ;;  %v4084_v15 = vld [vmem:[%s5110_s4 + $0x8] sm:$0xff]   ;;  %v4085_v17 = vld [vmem:[%s5110_s4] sm:$0xff]  }
  0x53   :  { %3625 = vmatprep.subr.bf16.mxu0 %v4335_v4  ;;  %3655 = vmatprep.mubr.msk.bf16.mxu1 %vm4336_vm2, %v4335_v4  ;;  %v3354_v28 = vld [vmem:[%s5111_s6] ss:$0 sm:$0xff] }
  0x56   :  { %3626 = vmatpush3.bf16.msra.mxu0 %v4083_v5 }
  0x57   :  { %3631 = vmatprep.subr.bf16.mxu0 %v4335_v4 }
 0x112   :  { %v3622_v7 = vpop.f32.mrf.mxu1 }
 0x113   :  { %v230_v8 = vadd.f32 %v3622_v7, %v3350_v6 }
 0x114   :  { %v224_v10 = vpop.f32.mrf.mxu1 }
 0x115   :  { %v225_v12 = vadd.f32 %v3350_v6, %v224_v10  ;;  %v4499_v13 = vadd.f32 %v234_v9, %v230_v8 }
 0x117   :  { %v4501_v14 = vadd.f32 %v233_v11, %v225_v12 }
 0x119   :  { %v237_v16 = vpack.c.bf16 %v4499_v13, %v4501_v14 }
 0x11b   :  { %3628 = vmatmul.mubr.msk.bf16.vlgmr.msra.gmra.mxu0 %vm261_vm3, %v237_v16 }
 0x11c   :  { %3632 = vmatpush3.bf16.msra.mxu0 %v4084_v15  ;;  %3635 = vmatprep.mubr.msk.bf16.mxu0 %vm4336_vm2, %v4335_v4 }
 0x11d   :  { %3633 = vmatprep.subr.bf16.mxu0 %v4335_v4 }
 0x120   :  { %3634 = vmatpush3.bf16.msra.mxu0 %v4085_v17 }
 0x121   :  { %3639 = vmatprep.subr.bf16.mxu0 %v4335_v4 }
 0x123   :  { %3636 = vmatmul.mubr.msk.bf16.vlgmr.msra.gmra.mxu0 %vm261_vm3, %v237_v16 }
 0x124   :  { %3640 = vmatpush3.bf16.msra.mxu0 %v4086_v18  ;;  %3643 = vmatprep.mubr.msk.bf16.mxu0 %vm4336_vm2, %v4335_v4 }
 0x125   :  { %3641 = vmatprep.subr.bf16.mxu0 %v4335_v4 }
 0x128   :  { %3642 = vmatpush3.bf16.msra.mxu0 %v4087_v19 }
 0x129   :  { %3647 = vmatprep.subr.bf16.mxu0 %v4335_v4 }
 0x12b   :  { %3644 = vmatmul.mubr.msk.bf16.vlgmr.msra.gmra.mxu0 %vm261_vm3, %v237_v16 }
 0x12c   :  { %3649 = vmatprep.mubr.msk.bf16.mxu0 %vm4336_vm2, %v4335_v4 }
 0x1db   :  { %v299_v20 = vpop.f32.mrf.mxu0 }
 0x1dc   :  { %v300_v33 = vadd.f32 %v3354_v28, %v299_v20 }
 0x1dd   :  { %v3629_v21 = vpop.f32.mrf.mxu0 }
 0x1de   :  { %v494_v42 = vpack.c.bf16 %v300_v33, %v300_v33 }
 0x1df   :  { %v302_v22 = vpop.f32.mrf.mxu0 }
 0x1e0   :  { %v303_v35 = vadd.f32 %v3354_v28, %v302_v22 }
 0x1e1   :  { %v3630_v23 = vpop.f32.mrf.mxu0 }
 0x1e2   :  { %v3977_v43 = vpack.i.bf16 %v303_v35, %v300_v33  ;;  %v495_v47 = vpack.c.bf16 %v303_v35, %v303_v35 }
 0x1e3   :  { %v363_v25 = vpop.f32.mrf.mxu0 }
 0x1e4   :  { %v364_v26 = vadd.f32 %v3358_v24, %v363_v25 }
 0x1e5   :  { %v3637_v27 = vpop.f32.mrf.mxu0 }
 0x1e6   :  { %v502_v29 = vpack.c.bf16 %v364_v26, %v364_v26 }
 0x1e7   :  { %v366_v30 = vpop.f32.mrf.mxu0 }
 0x1e8   :  { %v367_v31 = vadd.f32 %v3358_v24, %v366_v30  ;;  %v515_v32 = vsel %vm510_vm4, %v502_v29, 0 }
 0x1e9   :  { %v3638_v34 = vpop.f32.mrf.mxu0  ;;  %3648 = vmatpush3.bf16.xpose.msra.mxu0 %v515_v32 }
 0x1ea   :  { %v3972_v36 = vpack.i.bf16 %v367_v31, %v364_v26  ;;  %v503_v37 = vpack.c.bf16 %v367_v31, %v367_v31  ;;  %3659 = vmatprep.subr.bf16.mxu0 %v4335_v4 }
 0x1eb   :  { %v427_v38 = vpop.f32.mrf.mxu0 }
 0x1ec   :  { %3973 = vrot.lane.b32.xlu1 %v3972_v36, %s4337_s25  ;;  %3963 = vrot.lane.b32.xlu0 %v3972_v36, %s4338_s26  ;;  %v561_v39 = vsel %vm510_vm4, %v503_v37, 0  ;;  %v4539_v45 = vadd.f32 %v3362_v40, %v427_v38 }
 0x1ed   :  { %v3645_v41 = vpop.f32.mrf.mxu0  ;;  %3654 = vmatpush3.bf16.xpose.msra.mxu1 %v561_v39 }
 0x1ee   :  { %3665 = vmatprep.subr.bf16.mxu1 %v4335_v4  ;;  %v975_v23 = vpack.c.bf16 %v4539_v45, %v4539_v45 }
 0x1ef   :  { %v430_v44 = vpop.f32.mrf.mxu0 }
 0x1f0   :  { %v4541_v46 = vadd.f32 %v3362_v40, %v430_v44  ;;  %3650 = vmatmul.mubr.msk.bf16.vlgmr.msra.gmra.mxu0 %vm510_vm4, %v494_v42  ;;  %3978 = vrot.lane.b32.xlu1 %v3977_v43, %s4337_s25  ;;  %v988_v27 = vsel %vm986_vm5, %v975_v23, 0 }
 0x1f1   :  { %3968 = vrot.lane.b32.xlu0 %v3977_v43, %s4338_s26  ;;  %v3646_v48 = vpop.f32.mrf.mxu0  ;;  %3661 = vmatprep.mubr.msk.bf16.mxu0 %vm4336_vm2, %v4335_v4 }
 0x1f2   :  { %v4550_v49 = vpack.i.bf16 %v4541_v46, %v4539_v45  ;;  %v976_v24 = vpack.c.bf16 %v4541_v46, %v4541_v46 }
 0x1f4   :  { %3988 = vrot.lane.b32.xlu1 %v3977_v43, %s4339_s2  ;;  %3656 = vmatmul.mubr.msk.bf16.vlgmr.msra.gmra.mxu1 %vm510_vm4, %v495_v47  ;;  %v1034_v28 = vsel %vm986_vm5, %v976_v24, 0 }
 0x1f5   :  { %3983 = vrot.lane.b32.xlu0 %v3972_v36, %s4339_s2  ;;  %3667 = vmatprep.mubr.msk.bf16.mxu1 %vm4336_vm2, %v4335_v4 }
 0x25e   :  { %v3964_v50 = vpop.permute.xlu0 %3963  ;;  %v3974_v53 = vpop.permute.xlu1 %3973 }
 0x25f   :  { %v3966_v51 = vunpack.i.h.bf16 %v3964_v50  ;;  %v3965_v52 = vunpack.i.l.bf16 %v3964_v50  ;;  %v3976_v56 = vunpack.i.h.bf16 %v3974_v53  ;;  %v3975_v57 = vunpack.i.l.bf16 %v3974_v53 }
 0x261   :  { %v505_v54 = vpack.c.bf16 %v3966_v51, %v3966_v51  ;;  %v504_v55 = vpack.c.bf16 %v3965_v52, %v3965_v52  ;;  %v507_v63 = vpack.c.bf16 %v3976_v56, %v3976_v56  ;;  %v506_v0 = vpack.c.bf16 %v3975_v57, %v3975_v57 }
 0x262   :  { %v3979_v5 = vpop.permute.xlu1 %3978 }
 0x263   :  { %v3969_v58 = vpop.permute.xlu0 %3968  ;;  %v607_v59 = vsel %vm510_vm4, %v504_v55, 0  ;;  %v653_v60 = vsel %vm510_vm4, %v505_v54, 0  ;;  %v699_v8 = vsel %vm510_vm4, %v506_v0, 0  ;;  %v745_v9 = vsel %vm510_vm4, %v507_v63, 0 }
 0x264   :  { %3660 = vmatpush3.bf16.xpose.msra.mxu0 %v607_v59  ;;  %3666 = vmatpush3.bf16.xpose.msra.mxu1 %v653_v60  ;;  %v3971_v61 = vunpack.i.h.bf16 %v3969_v58  ;;  %v3970_v62 = vunpack.i.l.bf16 %v3969_v58  ;;  %v3981_v10 = vunpack.i.h.bf16 %v3979_v5  ;;  %v3980_v11 = vunpack.i.l.bf16 %v3979_v5 }
 0x265   :  { %3671 = vmatprep.subr.bf16.mxu0 %v4335_v4  ;;  %3677 = vmatprep.subr.bf16.mxu1 %v4335_v4 }
 0x266   :  { %v497_v2 = vpack.c.bf16 %v3971_v61, %v3971_v61  ;;  %v496_v3 = vpack.c.bf16 %v3970_v62, %v3970_v62  ;;  %v499_v16 = vpack.c.bf16 %v3981_v10, %v3981_v10  ;;  %v498_v17 = vpack.c.bf16 %v3980_v11, %v3980_v11  ;;  %v3989_v18 = vpop.permute.xlu1 %3988 }
 0x267   :  { %v3984_v1 = vpop.permute.xlu0 %3983  ;;  %v3991_v21 = vunpack.i.h.bf16 %v3989_v18  ;;  %v3990_v22 = vunpack.i.l.bf16 %v3989_v18 }
 0x268   :  { %v3986_v6 = vunpack.i.h.bf16 %v3984_v1  ;;  %v3985_v7 = vunpack.i.l.bf16 %v3984_v1 }
 0x269   :  { %v501_v25 = vpack.c.bf16 %v3991_v21, %v3991_v21  ;;  %v500_v26 = vpack.c.bf16 %v3990_v22, %v3990_v22 }
 0x26a   :  { %v509_v12 = vpack.c.bf16 %v3986_v6, %v3986_v6  ;;  %v508_v15 = vpack.c.bf16 %v3985_v7, %v3985_v7 }
 0x26b   :  { %3662 = vmatmul.mubr.msk.bf16.vlgmr.msra.gmra.mxu0 %vm510_vm4, %v496_v3  ;;  %3668 = vmatmul.mubr.msk.bf16.vlgmr.msra.gmra.mxu1 %vm510_vm4, %v497_v2 }
 0x26c   :  { %3672 = vmatpush3.bf16.xpose.msra.mxu0 %v699_v8  ;;  %3678 = vmatpush3.bf16.xpose.msra.mxu1 %v745_v9  ;;  %v791_v19 = vsel %vm510_vm4, %v508_v15, 0  ;;  %v837_v20 = vsel %vm510_vm4, %v509_v12, 0 }
 0x26d   :  { %3673 = vmatprep.mubr.msk.bf16.mxu0 %vm4336_vm2, %v4335_v4  ;;  %3679 = vmatprep.mubr.msk.bf16.mxu1 %vm4336_vm2, %v4335_v4 }
 0x26e   :  { %3683 = vmatprep.subr.bf16.mxu0 %v4335_v4  ;;  %3689 = vmatprep.subr.bf16.mxu1 %v4335_v4 }
 0x273   :  { %3674 = vmatmul.mubr.msk.bf16.vlgmr.msra.gmra.mxu0 %vm510_vm4, %v498_v17  ;;  %3680 = vmatmul.mubr.msk.bf16.vlgmr.msra.gmra.mxu1 %vm510_vm4, %v499_v16 }
 0x274   :  { %3684 = vmatpush3.bf16.xpose.msra.mxu0 %v791_v19  ;;  %3690 = vmatpush3.bf16.xpose.msra.mxu1 %v837_v20 }
 0x275   :  { %3685 = vmatprep.mubr.msk.bf16.mxu0 %vm4336_vm2, %v4335_v4  ;;  %3691 = vmatprep.mubr.msk.bf16.mxu1 %vm4336_vm2, %v4335_v4 }
 0x276   :  { %3695 = vmatprep.subr.bf16.mxu0 %v4335_v4  ;;  %3701 = vmatprep.subr.bf16.mxu1 %v4335_v4 }
 0x27b   :  { %3686 = vmatmul.mubr.msk.bf16.vlgmr.msra.gmra.mxu0 %vm510_vm4, %v500_v26  ;;  %3692 = vmatmul.mubr.msk.bf16.vlgmr.msra.gmra.mxu1 %vm510_vm4, %v501_v25 }
 0x27c   :  { %3696 = vmatpush3.bf16.msra.mxu0 %v988_v27  ;;  %3702 = vmatpush3.bf16.msra.mxu1 %v1034_v28 }
 0x27d   :  { %3703 = vmatprep.mubr.msk.bf16.mxu1 %vm4336_vm2, %v4335_v4  ;;  %3713 = vmatprep.subr.bf16.mxu1 %v4335_v4 }
 0x27e   :  { %3697 = vmatprep.mubr.msk.bf16.mxu0 %vm4336_vm2, %v4335_v4  ;;  %3707 = vmatprep.subr.bf16.mxu0 %v4335_v4 }
 0x2b0   :  { %v551_v29 = vpop.f32.mrf.mxu0 }
 0x2b1   :  { %v879_v30 = vsel %vm510_vm4, %v551_v29, -inf }
 0x2b2   :  { %880 = vmax.xlane.f32.xlu0 %v879_v30  ;;  %v3651_v31 = vpop.f32.mrf.mxu0 }
 0x2b4   :  { %v554_v32 = vpop.f32.mrf.mxu0  ;;  %v597_v33 = vpop.f32.mrf.mxu1 }
 0x2b5   :  { %v882_v34 = vsel %vm510_vm4, %v597_v33, -inf }
 0x2b6   :  { %883 = vmax.xlane.f32.xlu1 %v882_v34  ;;  %v3652_v35 = vpop.f32.mrf.mxu0  ;;  %v3657_v36 = vpop.f32.mrf.mxu1 }
 0x2b8   :  { %v600_v37 = vpop.f32.mrf.mxu1 }
 0x2ba   :  { %v3658_v38 = vpop.f32.mrf.mxu1 }
 0x32b   :  { %v643_v39 = vpop.f32.mrf.mxu0  ;;  %v689_v40 = vpop.f32.mrf.mxu1 }
 0x32c   :  { %v885_v41 = vsel %vm510_vm4, %v643_v39, -inf  ;;  %v888_v46 = vsel %vm510_vm4, %v689_v40, -inf }
 0x32d   :  { %v3669_v42 = vpop.f32.mrf.mxu1  ;;  %886 = vmax.xlane.f32.xlu0 %v885_v41  ;;  %v3663_v43 = vpop.f32.mrf.mxu0 }
 0x32f   :  { %v646_v44 = vpop.f32.mrf.mxu0  ;;  %v692_v45 = vpop.f32.mrf.mxu1 }
 0x331   :  { %v3670_v47 = vpop.f32.mrf.mxu1  ;;  %889 = vmax.xlane.f32.xlu0 %v888_v46  ;;  %v3664_v48 = vpop.f32.mrf.mxu0 }
 0x333   :  { %v735_v50 = vpop.f32.mrf.mxu0  ;;  %v781_v51 = vpop.f32.mrf.mxu1 }
 0x334   :  { %v894_v52 = vsel %vm510_vm4, %v781_v51, -inf  ;;  %v891_v53 = vsel %vm510_vm4, %v735_v50, -inf }
 0x335   :  { %v3681_v54 = vpop.f32.mrf.mxu1  ;;  %895 = vmax.xlane.f32.xlu0 %v894_v52  ;;  %892 = vmax.xlane.f32.xlu1 %v891_v53  ;;  %v3675_v55 = vpop.f32.mrf.mxu0 }
 0x337   :  { %v738_v56 = vpop.f32.mrf.mxu0  ;;  %v784_v57 = vpop.f32.mrf.mxu1 }
 0x339   :  { %v3676_v58 = vpop.f32.mrf.mxu0  ;;  %v3682_v59 = vpop.f32.mrf.mxu1 }
 0x33b   :  { %v873_v60 = vpop.f32.mrf.mxu1  ;;  %v827_v61 = vpop.f32.mrf.mxu0 }
 0x33c   :  { %v900_v62 = vsel %vm510_vm4, %v873_v60, -inf  ;;  %v897_v0 = vsel %vm510_vm4, %v827_v61, -inf  ;;  %v881_v12 = vpop.xlane.xlu0 %880 }
 0x33d   :  { %v3693_v63 = vpop.f32.mrf.mxu1  ;;  %901 = vmax.xlane.f32.xlu0 %v900_v62  ;;  %898 = vmax.xlane.f32.xlu1 %v897_v0  ;;  %v3687_v1 = vpop.f32.mrf.mxu0  ;;  %v903_v15 = vsub.f32 %v551_v29, %v881_v12 }
 0x33f   :  { %v884_v2 = vpop.xlane.xlu1 %883  ;;  %v876_v3 = vpop.f32.mrf.mxu1  ;;  %v911_v16 = vmul.f32 1.442695, %v903_v15 }
 0x340   :  { %v904_v5 = vsub.f32 %v597_v33, %v884_v2  ;;  %v830_v6 = vpop.f32.mrf.mxu0 }
 0x341   :  { %v3694_v7 = vpop.f32.mrf.mxu1 }
 0x342   :  { %v913_v8 = vmul.f32 1.442695, %v904_v5  ;;  %v3688_v9 = vpop.f32.mrf.mxu0 }
 0x344   :  { %4118 = vpow2.f32 %v913_v8 }
 0x345   :  { %4120 = vpow2.f32 %v911_v16 }
 0x34e   :  { %3993 = vrot.lane.b32.xlu1 %v4550_v49, %s4338_s26 }
 0x351   :  { %v4119_v10 = vpop.eup %4118 }
 0x352   :  { %v930_v11 = vsel %vm510_vm4, %v4119_v10, 0.0  ;;  %v4606_v17 = vpop.eup %4120 }
 0x353   :  { %931 = vadd.xlane.f32.xlu0 %v930_v11  ;;  %v927_v18 = vsel %vm510_vm4, %v4606_v17, 0.0 }
 0x372   :  { %928 = vadd.xlane.f32.xlu1 %v927_v18 }
 0x3b6   :  { %v887_v19 = vpop.xlane.xlu0 %886 }
 0x3b7   :  { %v905_v20 = vsub.f32 %v643_v39, %v887_v19 }
 0x3b9   :  { %v915_v21 = vmul.f32 1.442695, %v905_v20 }
 0x3ba   :  { %v890_v22 = vpop.xlane.xlu0 %889 }
 0x3bb   :  { %4122 = vpow2.f32 %v915_v21  ;;  %v906_v23 = vsub.f32 %v689_v40, %v890_v22 }
 0x3bd   :  { %v917_v24 = vmul.f32 1.442695, %v906_v23 }
 0x3be   :  { %v896_v25 = vpop.xlane.xlu0 %895  ;;  %v893_v26 = vpop.xlane.xlu1 %892 }
 0x3bf   :  { %4124 = vpow2.f32 %v917_v24  ;;  %v908_v27 = vsub.f32 %v781_v51, %v896_v25  ;;  %v907_v28 = vsub.f32 %v735_v50, %v893_v26 }
 0x3c1   :  { %v921_v29 = vmul.f32 1.442695, %v908_v27  ;;  %v919_v30 = vmul.f32 1.442695, %v907_v28 }
 0x3c3   :  { %4126 = vpow2.f32 %v921_v29 }
 0x3c4   :  { %4128 = vpow2.f32 %v919_v30 }
 0x3c6   :  { %v902_v31 = vpop.xlane.xlu0 %901  ;;  %v899_v33 = vpop.xlane.xlu1 %898 }
 0x3c7   :  { %v910_v32 = vsub.f32 %v873_v60, %v902_v31  ;;  %v909_v35 = vsub.f32 %v827_v61, %v899_v33 }
 0x3c8   :  { %v4123_v34 = vpop.eup %4122 }
 0x3c9   :  { %v925_v36 = vmul.f32 1.442695, %v910_v32  ;;  %v933_v37 = vsel %vm510_vm4, %v4123_v34, 0.0  ;;  %v923_v38 = vmul.f32 1.442695, %v909_v35 }
 0x3ca   :  { %934 = vadd.xlane.f32.xlu1 %v933_v37  ;;  %v3994_v51 = vpop.permute.xlu1 %3993 }
 0x3cb   :  { %4130 = vpow2.f32 %v925_v36  ;;  %v3996_v52 = vunpack.i.h.bf16 %v3994_v51  ;;  %v3995_v59 = vunpack.i.l.bf16 %v3994_v51 }
 0x3cc   :  { %v4125_v39 = vpop.eup %4124  ;;  %4132 = vpow2.f32 %v923_v38 }
 0x3cd   :  { %v936_v40 = vsel %vm510_vm4, %v4125_v39, 0.0  ;;  %v978_v54 = vpack.c.bf16 %v3996_v52, %v3996_v52  ;;  %v977_v61 = vpack.c.bf16 %v3995_v59, %v3995_v59 }
 0x3ce   :  { %937 = vadd.xlane.f32.xlu0 %v936_v40 }
 0x3cf   :  { %v1126_v57 = vsel %vm986_vm5, %v978_v54, 0  ;;  %v1080_v0 = vsel %vm986_vm5, %v977_v61, 0  ;;  %v4088_v54 = vld [vmem:[%s5078_s10 + $0x8] sm:$0xff]  }
 0x3d0   :  { %v4612_v41 = vpop.eup %4126 }
 0x3d1   :  { %v4614_v42 = vpop.eup %4128  ;;  %v942_v43 = vsel %vm510_vm4, %v4612_v41, 0.0 }
 0x3d2   :  { %943 = vadd.xlane.f32.xlu0 %v942_v43  ;;  %v939_v44 = vsel %vm510_vm4, %v4614_v42, 0.0 }
 0x3d3   :  { %940 = vadd.xlane.f32.xlu1 %v939_v44 }
 0x3d8   :  { %v4620_v45 = vpop.eup %4130 }
 0x3d9   :  { %v4622_v46 = vpop.eup %4132  ;;  %v948_v47 = vsel %vm510_vm4, %v4620_v45, 0.0 }
 0x3da   :  { %949 = vadd.xlane.f32.xlu0 %v948_v47  ;;  %v945_v48 = vsel %vm510_vm4, %v4622_v46, 0.0 }
 0x3db   :  { %946 = vadd.xlane.f32.xlu1 %v945_v48 }
 0x3dc   :  { %v932_v50 = vpop.xlane.xlu0 %931 }
 0x3dd   :  { %4134 = vrcp.f32 %v932_v50 }
 0x3ea   :  { %v4135_v53 = vpop.eup %4134 }
 0x3eb   :  { %v960_v55 = vmul.f32 %v4135_v53, %v4119_v10 }
 0x3ec   :  { %4003 = vrot.lane.b32.xlu1 %v4550_v49, %s4339_s2 }
 0x3ed   :  { %v968_v56 = vpack.c.bf16 %v960_v55, %v960_v55 }
 0x3ef   :  { %3704 = vmatmul.mubr.msk.bf16.vlgmr.msra.gmra.mxu1 %vm510_vm4, %v968_v56 }
 0x3f0   :  { %3714 = vmatpush3.bf16.msra.mxu1 %v1126_v57  ;;  %3998 = vrot.lane.b32.xlu0 %v4550_v49, %s4337_s25 }
 0x3f1   :  { %3715 = vmatprep.mubr.msk.bf16.mxu1 %vm4336_vm2, %v4335_v4  ;;  %3725 = vmatprep.subr.bf16.mxu1 %v4335_v4 }
 0x3fb   :  { %v929_v58 = vpop.xlane.xlu1 %928 }
 0x3fc   :  { %4136 = vrcp.f32 %v929_v58 }
 0x409   :  { %v4137_v60 = vpop.eup %4136 }
 0x40a   :  { %v959_v62 = vmul.f32 %v4137_v60, %v4606_v17 }
 0x40c   :  { %v967_v63 = vpack.c.bf16 %v959_v62, %v959_v62 }
 0x40e   :  { %3698 = vmatmul.mubr.msk.bf16.vlgmr.msra.gmra.mxu0 %vm510_vm4, %v967_v63  ;;  %v4089_v63 = vld [vmem:[%s5078_s10] sm:$0xff]  }
 0x40f   :  { %3708 = vmatpush3.bf16.msra.mxu0 %v1080_v0  ;;  %3709 = vmatprep.mubr.msk.bf16.mxu0 %vm4336_vm2, %v4335_v4 }
 0x410   :  { %3719 = vmatprep.subr.bf16.mxu0 %v4335_v4 }
 0x453   :  { %v935_v49 = vpop.xlane.xlu1 %934 }
 0x454   :  { %4138 = vrcp.f32 %v935_v49 }
 0x457   :  { %v938_v1 = vpop.xlane.xlu0 %937 }
 0x458   :  { %4140 = vrcp.f32 %v938_v1 }
 0x45b   :  { %v944_v2 = vpop.xlane.xlu0 %943 }
 0x45c   :  { %4142 = vrcp.f32 %v944_v2  ;;  %v941_v3 = vpop.xlane.xlu1 %940 }
 0x45d   :  { %4144 = vrcp.f32 %v941_v3 }
 0x461   :  { %v4139_v5 = vpop.eup %4138 }
 0x462   :  { %v961_v6 = vmul.f32 %v4139_v5, %v4123_v34 }
 0x463   :  { %v950_v7 = vpop.xlane.xlu0 %949 }
 0x464   :  { %4146 = vrcp.f32 %v950_v7  ;;  %v947_v8 = vpop.xlane.xlu1 %946  ;;  %v969_v9 = vpack.c.bf16 %v961_v6, %v961_v6 }
 0x465   :  { %v4141_v10 = vpop.eup %4140  ;;  %4148 = vrcp.f32 %v947_v8 }
 0x466   :  { %3710 = vmatmul.mubr.msk.bf16.vlgmr.msra.gmra.mxu0 %vm510_vm4, %v969_v9  ;;  %v962_v11 = vmul.f32 %v4141_v10, %v4125_v39 }
 0x467   :  { %v3999_v12 = vpop.permute.xlu0 %3998  ;;  %3721 = vmatprep.mubr.msk.bf16.mxu0 %vm4336_vm2, %v4335_v4 }
 0x468   :  { %v4001_v15 = vunpack.i.h.bf16 %v3999_v12  ;;  %v4000_v16 = vunpack.i.l.bf16 %v3999_v12  ;;  %v4004_v17 = vpop.permute.xlu1 %4003  ;;  %v970_v18 = vpack.c.bf16 %v962_v11, %v962_v11 }
 0x469   :  { %v4143_v19 = vpop.eup %4142  ;;  %v4005_v20 = vunpack.i.l.bf16 %v4004_v17  ;;  %v4006_v24 = vunpack.i.h.bf16 %v4004_v17 }
 0x46a   :  { %v4145_v21 = vpop.eup %4144  ;;  %v980_v22 = vpack.c.bf16 %v4001_v15, %v4001_v15  ;;  %v979_v23 = vpack.c.bf16 %v4000_v16, %v4000_v16  ;;  %3716 = vmatmul.mubr.msk.bf16.vlgmr.msra.gmra.mxu1 %vm510_vm4, %v970_v18  ;;  %v964_v29 = vmul.f32 %v4143_v19, %v4612_v41 }
 0x46b   :  { %v963_v25 = vmul.f32 %v4145_v21, %v4614_v42  ;;  %3727 = vmatprep.mubr.msk.bf16.mxu1 %vm4336_vm2, %v4335_v4  ;;  %v981_v26 = vpack.c.bf16 %v4005_v20, %v4005_v20  ;;  %v982_v30 = vpack.c.bf16 %v4006_v24, %v4006_v24 }
 0x46c   :  { %v1172_v27 = vsel %vm986_vm5, %v979_v23, 0  ;;  %v1218_v28 = vsel %vm986_vm5, %v980_v22, 0  ;;  %v972_v33 = vpack.c.bf16 %v964_v29, %v964_v29 }
 0x46d   :  { %3720 = vmatpush3.bf16.msra.mxu0 %v1172_v27  ;;  %3726 = vmatpush3.bf16.msra.mxu1 %v1218_v28  ;;  %v971_v31 = vpack.c.bf16 %v963_v25, %v963_v25  ;;  %v1264_v32 = vsel %vm986_vm5, %v981_v26, 0  ;;  %v1310_v36 = vsel %vm986_vm5, %v982_v30, 0 }
 0x46e   :  { %3731 = vmatprep.subr.bf16.mxu0 %v4335_v4  ;;  %3737 = vmatprep.subr.bf16.mxu1 %v4335_v4 }
 0x470   :  { %3722 = vmatmul.mubr.msk.bf16.vlgmr.msra.gmra.mxu0 %vm510_vm4, %v971_v31 }
 0x471   :  { %v4147_v34 = vpop.eup %4146  ;;  %3732 = vmatpush3.bf16.msra.mxu0 %v1264_v32  ;;  %3733 = vmatprep.mubr.msk.bf16.mxu0 %vm4336_vm2, %v4335_v4 }
 0x472   :  { %v4149_v35 = vpop.eup %4148  ;;  %3728 = vmatmul.mubr.msk.bf16.vlgmr.msra.gmra.mxu1 %vm510_vm4, %v972_v33  ;;  %3743 = vmatprep.subr.bf16.mxu0 %v4335_v4  ;;  %v966_v38 = vmul.f32 %v4147_v34, %v4620_v45  ;;  %v3382_v33 = vld [vmem:[%s5079_s11] ss:$0 sm:$0xff] }
 0x473   :  { %3738 = vmatpush3.bf16.msra.mxu1 %v1310_v36  ;;  %v965_v37 = vmul.f32 %v4149_v35, %v4622_v46  ;;  %3739 = vmatprep.mubr.msk.bf16.mxu1 %vm4336_vm2, %v4335_v4 }
 0x474   :  { %3751 = vmatprep.subr.bf16.mxu1 %v4335_v4  ;;  %v974_v40 = vpack.c.bf16 %v966_v38, %v966_v38 }
 0x475   :  { %v973_v39 = vpack.c.bf16 %v965_v37, %v965_v37 }
 0x478   :  { %3734 = vmatmul.mubr.msk.bf16.vlgmr.msra.gmra.mxu0 %vm510_vm4, %v973_v39 }
 0x479   :  { %3747 = vmatprep.mubr.msk.bf16.mxu0 %vm4336_vm2, %v4335_v4  ;;  %3744 = vmatpush3.bf16.msra.mxu0 %v4088_v54  ;;  %v4091_v54 = vld [vmem:[%s5080_s12] sm:$0xff]  }
 0x47a   :  { %3740 = vmatmul.mubr.msk.bf16.vlgmr.msra.gmra.mxu1 %vm510_vm4, %v974_v40  ;;  %3745 = vmatprep.subr.bf16.mxu0 %v4335_v4 }
 0x47b   :  { %3755 = vmatprep.mubr.msk.bf16.mxu1 %vm4336_vm2, %v4335_v4 }
 0x47d   :  { %3746 = vmatpush3.bf16.msra.mxu0 %v4089_v63 }
 0x47e   :  { %3759 = vmatprep.subr.bf16.mxu0 %v4335_v4 }
 0x4af   :  { %v1070_v41 = vpop.f32.mrf.mxu1 }
 0x4b1   :  { %v3705_v42 = vpop.f32.mrf.mxu1 }
 0x4b3   :  { %v1073_v43 = vpop.f32.mrf.mxu1 }
 0x4b5   :  { %v3706_v44 = vpop.f32.mrf.mxu1 }
 0x4ce   :  { %v1024_v46 = vpop.f32.mrf.mxu0 }
 0x4d0   :  { %v3699_v45 = vpop.f32.mrf.mxu0 }
 0x4d2   :  { %v1027_v47 = vpop.f32.mrf.mxu0 }
 0x4d4   :  { %v3700_v48 = vpop.f32.mrf.mxu0 }
 0x526   :  { %v1116_v50 = vpop.f32.mrf.mxu0 }
 0x528   :  { %v3711_v51 = vpop.f32.mrf.mxu0 }
 0x52a   :  { %v1119_v52 = vpop.f32.mrf.mxu0  ;;  %v1162_v53 = vpop.f32.mrf.mxu1 }
 0x52b   :  { %v4007_v55 = vpack.i.bf16 %v1162_v53, %v1116_v50 }
 0x52c   :  { %v3712_v56 = vpop.f32.mrf.mxu0  ;;  %v3717_v57 = vpop.f32.mrf.mxu1 }
 0x52d   :  { %4008 = vrot.lane.b32.xlu1 %v4007_v55, %s4332_s29  ;;  %v4092_v55 = vld [vmem:[%s5082_s14 + $0x38] sm:$0xff]   ;;  %v4093_v56 = vld [vmem:[%s5082_s14 + $0x30] sm:$0xff]   ;;  %v4094_v57 = vld [vmem:[%s5082_s14 + $0x28] sm:$0xff]  }
 0x52e   :  { %v1165_v58 = vpop.f32.mrf.mxu1 }
 0x52f   :  { %v4095_v58 = vld [vmem:[%s5082_s14 + $0x20] sm:$0xff]  }
 0x530   :  { %v3718_v59 = vpop.f32.mrf.mxu1  ;;  %v1208_v60 = vpop.f32.mrf.mxu0 }
 0x531   :  { %v4096_v59 = vld [vmem:[%s5082_s14 + $0x18] sm:$0xff]  }
 0x532   :  { %v3723_v61 = vpop.f32.mrf.mxu0  ;;  %v1254_v62 = vpop.f32.mrf.mxu1 }
 0x533   :  { %v4012_v0 = vpack.i.bf16 %v1254_v62, %v1208_v60 }
 0x534   :  { %v1211_v49 = vpop.f32.mrf.mxu0  ;;  %v3729_v1 = vpop.f32.mrf.mxu1 }
 0x535   :  { %4013 = vrot.lane.b32.xlu0 %v4012_v0, %s5107_s27 }
 0x536   :  { %v3724_v2 = vpop.f32.mrf.mxu0  ;;  %v1257_v3 = vpop.f32.mrf.mxu1 }
 0x537   :  { %v3386_v3 = vld [vmem:[%s5084_s16] ss:$0 sm:$0xff] }
 0x538   :  { %v3730_v5 = vpop.f32.mrf.mxu1  ;;  %v1300_v6 = vpop.f32.mrf.mxu0 }
 0x53a   :  { %v3735_v7 = vpop.f32.mrf.mxu0  ;;  %v1346_v8 = vpop.f32.mrf.mxu1 }
 0x53b   :  { %v4017_v9 = vpack.i.bf16 %v1346_v8, %v1300_v6  ;;  %v3387_v8 = vld [vmem:[%s5085_s17] ss:$0 sm:$0xff] }
 0x53c   :  { %v1303_v10 = vpop.f32.mrf.mxu0  ;;  %v3741_v11 = vpop.f32.mrf.mxu1 }
 0x53d   :  { %4018 = vrot.lane.b32.xlu1 %v4017_v9, %s4340_s23 }
 0x53e   :  { %v3736_v12 = vpop.f32.mrf.mxu0  ;;  %v1349_v15 = vpop.f32.mrf.mxu1 }
 0x53f   :  { %v4097_v15 = vld [vmem:[%s5082_s14 + $0x10] sm:$0xff]  }
 0x540   :  { %v3742_v16 = vpop.f32.mrf.mxu1 }
 0x541   :  { %v4098_v16 = vld [vmem:[%s5082_s14 + $0x8] sm:$0xff]  }
 0x59f   :  { %v4009_v17 = vpop.permute.xlu1 %4008 }
 0x5a0   :  { %v4011_v19 = vunpack.i.h.bf16 %v4009_v17  ;;  %v4010_v20 = vunpack.i.l.bf16 %v4009_v17  ;;  %v4099_v17 = vld [vmem:[%s5082_s14] sm:$0xff]  }
 0x5a2   :  { %v1377_v24 = vsel %vm510_vm4, %v1070_v41, %v4011_v19  ;;  %v1376_v25 = vsel %vm510_vm4, %v1024_v46, %v4010_v20 }
 0x5a7   :  { %v4014_v18 = vpop.permute.xlu0 %4013 }
 0x5a8   :  { %v4016_v21 = vunpack.i.h.bf16 %v4014_v18  ;;  %v4015_v22 = vunpack.i.l.bf16 %v4014_v18  ;;  %v3388_v18 = vld [vmem:[%s5081_s13] ss:$0 sm:$0xff] }
 0x5aa   :  { %v1380_v28 = vsel %vm1378_vm6, %v1377_v24, %v4016_v21  ;;  %v1379_v29 = vsel %vm1378_vm6, %v1376_v25, %v4015_v22 }
 0x5af   :  { %v4019_v23 = vpop.permute.xlu1 %4018 }
 0x5b0   :  { %v4021_v26 = vunpack.i.h.bf16 %v4019_v23  ;;  %v4020_v27 = vunpack.i.l.bf16 %v4019_v23 }
 0x5b2   :  { %v1383_v30 = vsel %vm1381_vm7, %v1380_v28, %v4021_v26  ;;  %v1382_v31 = vsel %vm1381_vm7, %v1379_v29, %v4020_v27  ;;  %v3392_v28 = vld [vmem:[%s5083_s15] ss:$0 sm:$0xff] }
 0x5b3   :  { %v1384_v32 = vpack.c.bf16 %v1383_v30, %v1382_v31 }
 0x5b5   :  { %3748 = vmatmul.mubr.msk.bf16.vlgmr.msra.gmra.mxu0 %vm261_vm3, %v1384_v32 }
 0x5b6   :  { %3775 = vmatprep.mubr.msk.bf16.mxu0 %vm4336_vm2, %v4335_v4  ;;  %3760 = vmatpush3.bf16.msra.mxu0 %v4092_v55 }
 0x5b7   :  { %3761 = vmatprep.subr.bf16.mxu0 %v4335_v4 }
 0x5ba   :  { %3762 = vmatpush3.bf16.msra.mxu0 %v4093_v56 }
 0x5bb   :  { %3763 = vmatprep.subr.bf16.mxu0 %v4335_v4 }
 0x5be   :  { %3764 = vmatpush3.bf16.msra.mxu0 %v4094_v57 }
 0x5bf   :  { %3765 = vmatprep.subr.bf16.mxu0 %v4335_v4 }
 0x5c2   :  { %3766 = vmatpush3.bf16.msra.mxu0 %v4095_v58  ;;  %v3401_v58 = vld [vmem:[%s5086_s18] ss:$0 sm:$0xff] }
 0x5c3   :  { %3767 = vmatprep.subr.bf16.mxu0 %v4335_v4 }
 0x5c6   :  { %3768 = vmatpush3.bf16.msra.mxu0 %v4096_v59 }
 0x5c7   :  { %3769 = vmatprep.subr.bf16.mxu0 %v4335_v4 }
 0x5ca   :  { %3770 = vmatpush3.bf16.msra.mxu0 %v4097_v15 }
 0x5cb   :  { %3771 = vmatprep.subr.bf16.mxu0 %v4335_v4 }
 0x5ce   :  { %3772 = vmatpush3.bf16.msra.mxu0 %v4098_v16  ;;  %v3416_v16 = vld [vmem:[#allocation8 + $0x1] ss:$0 sm:$0xff] }
 0x5cf   :  { %3773 = vmatprep.subr.bf16.mxu0 %v4335_v4 }
 0x5d2   :  { %3774 = vmatpush3.bf16.msra.mxu0 %v4099_v17 }
 0x5d3   :  { %3809 = vmatprep.subr.bf16.mxu0 %v4335_v4 }
 0x675   :  { %v1445_v34 = vpop.f32.mrf.mxu0 }
 0x676   :  { %v1446_v35 = vadd.f32 %v3382_v33, %v1445_v34 }
 0x677   :  { %v3749_v36 = vpop.f32.mrf.mxu0 }
 0x678   :  { %v1452_v37 = vadd.f32 %v1446_v35, %v4501_v14 }
 0x679   :  { %v1448_v38 = vpop.f32.mrf.mxu0 }
 0x67a   :  { %v1449_v39 = vadd.f32 %v3382_v33, %v1448_v38  ;;  %v1456_v40 = vsel %vm261_vm3, %v1452_v37, 0.0 }
 0x67b   :  { %1457 = vadd.xlane.f32.xlu0 %v1456_v40  ;;  %v3750_v41 = vpop.f32.mrf.mxu0 }
 0x67c   :  { %v1453_v42 = vadd.f32 %v1449_v39, %v4499_v13  ;;  %v4090_v13 = vld [vmem:[%s5080_s12 + $0x8] sm:$0xff]  }
 0x67d   :  { %3752 = vmatpush3.bf16.msra.mxu1 %v4090_v13 }
 0x67e   :  { %v1459_v43 = vsel %vm261_vm3, %v1453_v42, 0.0  ;;  %3753 = vmatprep.subr.bf16.mxu1 %v4335_v4 }
 0x67f   :  { %1460 = vadd.xlane.f32.xlu1 %v1459_v43 }
 0x681   :  { %3754 = vmatpush3.bf16.msra.mxu1 %v4091_v54 }
 0x682   :  { %3779 = vmatprep.subr.bf16.mxu1 %v4335_v4 }
 0x704   :  { %v1458_v44 = vpop.xlane.xlu0 %1457 }
 0x705   :  { %v1463_v46 = vmul.f32 0.03125, %v1458_v44 }
 0x707   :  { %v1465_v45 = vsub.f32 %v1452_v37, %v1463_v46 }
 0x708   :  { %v1461_v47 = vpop.xlane.xlu1 %1460 }
 0x709   :  { %v1464_v48 = vmul.f32 0.03125, %v1461_v47  ;;  %v1467_v50 = vmul.f32 %v1465_v45, %v1465_v45 }
 0x70b   :  { %v1466_v51 = vsub.f32 %v1453_v42, %v1464_v48  ;;  %v1469_v14 = vsel %vm261_vm3, %v1467_v50, 0.0  ;;  %v4100_v50 = vld [vmem:[%s5109_s30 + $0x18] sm:$0xff]  }
 0x70c   :  { %1470 = vadd.xlane.f32.xlu0 %v1469_v14 }
 0x70d   :  { %v1468_v52 = vmul.f32 %v1466_v51, %v1466_v51 }
 0x70f   :  { %v1472_v53 = vsel %vm261_vm3, %v1468_v52, 0.0 }
 0x710   :  { %1473 = vadd.xlane.f32.xlu0 %v1472_v53 }
 0x795   :  { %v1471_v60 = vpop.xlane.xlu0 %1470 }
 0x796   :  { %v1475_v61 = vmul.f32 0.03125, %v1471_v60 }
 0x798   :  { %v1477_v62 = vadd.f32 1e-05, %v1475_v61 }
 0x799   :  { %v1474_v63 = vpop.xlane.xlu0 %1473 }
 0x79a   :  { %4150 = vrsqrt.f32 %v1477_v62  ;;  %v1476_v0 = vmul.f32 0.03125, %v1474_v63  ;;  %v3402_v62 = vld [vmem:[%s5087_s19] ss:$0 sm:$0xff] }
 0x79c   :  { %v1478_v49 = vadd.f32 1e-05, %v1476_v0 }
 0x79e   :  { %4152 = vrsqrt.f32 %v1478_v49 }
 0x7a7   :  { %v4151_v1 = vpop.eup %4150 }
 0x7a8   :  { %v1481_v2 = vmul.f32 %v4151_v1, %v1465_v45  ;;  %v4102_v1 = vld [vmem:[%s5110_s4 + $0x18] sm:$0xff]  }
 0x7aa   :  { %v1489_v7 = vmul.f32 %v3386_v3, %v1481_v2 }
 0x7ab   :  { %v4153_v5 = vpop.eup %4152 }
 0x7ac   :  { %v1482_v6 = vmul.f32 %v4153_v5, %v1466_v51  ;;  %v1497_v10 = vadd.f32 %v3387_v8, %v1489_v7  ;;  %v4101_v51 = vld [vmem:[%s5109_s30 + $0x10] sm:$0xff]   ;;  %v4104_v5 = vld [vmem:[%s5076_s8 + $0x18] sm:$0xff]  }
 0x7ae   :  { %v1490_v9 = vmul.f32 %v3386_v3, %v1482_v6  ;;  %v4103_v3 = vld [vmem:[%s5110_s4 + $0x10] sm:$0xff]   ;;  %s4341_s4 = smov [#allocation11]  }
 0x7af   :  { %v4105_v6 = vld [vmem:[%s5076_s8 + $0x10] sm:$0xff]   ;;  %s3339_s3 = sshll.u32 %s4341_s4, 4  ;;  %s3340_s3 = int_to_ptr.vmem [resolvable:$true] %s3339_s3 }
 0x7b0   :  { %v1498_v11 = vadd.f32 %v3387_v8, %v1490_v9  ;;  %v3408_v8 = vld [vmem:[%s5111_s6 + $0x1] ss:$0 sm:$0xff]  ;;  %s4298_s8 = scalar_lea.vmem %s3340_s3, 32  ;;  %p4303_p12 = scmp.lt.s32.totalorder %s3340_s3, %s3340_s3 }
 0x7b1   :  { %p4299_p11 = scmp.ne.s32.totalorder %s3340_s3, %s4298_s8  ;;  %p4304_p13 = scmp.lt.s32.totalorder %s4298_s8, %s4298_s8 }
 0x7b2   :  { %v1499_v12 = vpack.c.bf16 %v1498_v11, %v1497_v10 }
 0x7b3   :  { %p4305_p0 = por %p4304_p13, %p4303_p12 }
 0x7b4   :  { %3756 = vmatmul.mubr.msk.bf16.vlgmr.msra.gmra.mxu1 %vm261_vm3, %v1499_v12 }
 0x7b5   :  { %3783 = vmatprep.mubr.msk.bf16.mxu1 %vm4336_vm2, %v4335_v4  ;;  %3780 = vmatpush3.bf16.msra.mxu1 %v4100_v50  ;;  %p4306_p1 = pnand %p4305_p0, %p4299_p11 }
 0x7b6   :  { %3781 = vmatprep.subr.bf16.mxu1 %v4335_v4 }
 0x7b9   :  { %3782 = vmatpush3.bf16.msra.mxu1 %v4101_v51 }
 0x7ba   :  { %3787 = vmatprep.subr.bf16.mxu1 %v4335_v4 }
 0x874   :  { %v1560_v19 = vpop.f32.mrf.mxu1 }
 0x875   :  { %v1561_v21 = vadd.f32 %v3388_v18, %v1560_v19 }
 0x876   :  { %v3757_v20 = vpop.f32.mrf.mxu1 }
 0x877   :  { %v1567_v25 = vmax.f32 %v1561_v21, 0.0 }
 0x878   :  { %v1563_v22 = vpop.f32.mrf.mxu1 }
 0x879   :  { %v1564_v23 = vadd.f32 %v3388_v18, %v1563_v22 }
 0x87a   :  { %v3758_v24 = vpop.f32.mrf.mxu1 }
 0x87b   :  { %v1568_v26 = vmax.f32 %v1564_v23, 0.0 }
 0x87d   :  { %v1569_v27 = vpack.c.bf16 %v1568_v26, %v1567_v25 }
 0x87f   :  { %3776 = vmatmul.mubr.bf16.vlgmr.msra.gmra.mxu0 %v1569_v27 }
 0x880   :  { %3811 = vmatprep.mubr.msk.bf16.mxu0 %vm4336_vm2, %v4335_v4 }
 0x93f   :  { %v1675_v29 = vpop.f32.mrf.mxu0 }
 0x940   :  { %v1676_v30 = vadd.f32 %v3392_v28, %v1675_v29 }
 0x941   :  { %v3777_v31 = vpop.f32.mrf.mxu0 }
 0x942   :  { %v1682_v32 = vadd.f32 %v1676_v30, %v1497_v10  ;;  %v3424_v30 = vld [vmem:[#allocation10 + $0x1] ss:$0 sm:$0xff] }
 0x943   :  { %v1678_v33 = vpop.f32.mrf.mxu0 }
 0x944   :  { %v1679_v34 = vadd.f32 %v3392_v28, %v1678_v33  ;;  %v1686_v35 = vsel %vm261_vm3, %v1682_v32, 0.0 }
 0x945   :  { %1687 = vadd.xlane.f32.xlu1 %v1686_v35  ;;  %v3778_v36 = vpop.f32.mrf.mxu0 }
 0x946   :  { %v1683_v37 = vadd.f32 %v1679_v34, %v1498_v11 }
 0x948   :  { %v1689_v38 = vsel %vm261_vm3, %v1683_v37, 0.0 }
 0x949   :  { %1690 = vadd.xlane.f32.xlu0 %v1689_v38 }
 0x9ce   :  { %v1688_v39 = vpop.xlane.xlu1 %1687 }
 0x9cf   :  { %v1692_v40 = vmul.f32 0.03125, %v1688_v39 }
 0x9d1   :  { %v1694_v41 = vsub.f32 %v1682_v32, %v1692_v40 }
 0x9d2   :  { %v1691_v42 = vpop.xlane.xlu0 %1690 }
 0x9d3   :  { %v1693_v43 = vmul.f32 0.03125, %v1691_v42  ;;  %v1696_v44 = vmul.f32 %v1694_v41, %v1694_v41 }
 0x9d5   :  { %v1695_v46 = vsub.f32 %v1683_v37, %v1693_v43  ;;  %v1698_v45 = vsel %vm261_vm3, %v1696_v44, 0.0 }
 0x9d6   :  { %1699 = vadd.xlane.f32.xlu1 %v1698_v45 }
 0x9d7   :  { %v1697_v47 = vmul.f32 %v1695_v46, %v1695_v46 }
 0x9d9   :  { %v1701_v48 = vsel %vm261_vm3, %v1697_v47, 0.0 }
 0x9da   :  { %1702 = vadd.xlane.f32.xlu0 %v1701_v48 }
 0xa5f   :  { %v1700_v14 = vpop.xlane.xlu1 %1699 }
 0xa60   :  { %v1704_v52 = vmul.f32 0.03125, %v1700_v14 }
 0xa62   :  { %v1706_v53 = vadd.f32 1e-05, %v1704_v52 }
 0xa63   :  { %v1703_v13 = vpop.xlane.xlu0 %1702 }
 0xa64   :  { %4154 = vrsqrt.f32 %v1706_v53  ;;  %v1705_v54 = vmul.f32 0.03125, %v1703_v13 }
 0xa66   :  { %v1707_v55 = vadd.f32 1e-05, %v1705_v54 }
 0xa68   :  { %4156 = vrsqrt.f32 %v1707_v55 }
 0xa71   :  { %v4155_v56 = vpop.eup %4154 }
 0xa72   :  { %v1710_v57 = vmul.f32 %v4155_v56, %v1694_v41 }
 0xa74   :  { %v1718_v61 = vmul.f32 %v3401_v58, %v1710_v57 }
 0xa75   :  { %v4157_v59 = vpop.eup %4156 }
 0xa76   :  { %v1711_v60 = vmul.f32 %v4157_v59, %v1695_v46  ;;  %v4777_v0 = vadd.f32 %v3402_v62, %v1718_v61 }
 0xa78   :  { %v1719_v63 = vmul.f32 %v3401_v58, %v1711_v60 }
 0xa7a   :  { %v4779_v49 = vadd.f32 %v3402_v62, %v1719_v63 }
 0xa7c   :  { %v1728_v2 = vpack.c.bf16 %v4779_v49, %v4777_v0 }
 0xa7e   :  { %3784 = vmatmul.mubr.msk.bf16.vlgmr.msra.gmra.mxu1 %vm261_vm3, %v1728_v2 }
 0xa7f   :  { %3788 = vmatpush3.bf16.msra.mxu1 %v4102_v1  ;;  %3791 = vmatprep.mubr.msk.bf16.mxu1 %vm4336_vm2, %v4335_v4 }
 0xa80   :  { %3789 = vmatprep.subr.bf16.mxu1 %v4335_v4 }
 0xa83   :  { %3790 = vmatpush3.bf16.msra.mxu1 %v4103_v3 }
 0xa84   :  { %3795 = vmatprep.subr.bf16.mxu1 %v4335_v4 }
 0xa86   :  { %3792 = vmatmul.mubr.msk.bf16.vlgmr.msra.gmra.mxu1 %vm261_vm3, %v1728_v2 }
 0xa87   :  { %3796 = vmatpush3.bf16.msra.mxu1 %v4104_v5  ;;  %3799 = vmatprep.mubr.msk.bf16.mxu1 %vm4336_vm2, %v4335_v4 }
 0xa88   :  { %3797 = vmatprep.subr.bf16.mxu1 %v4335_v4 }
 0xa8b   :  { %3798 = vmatpush3.bf16.msra.mxu1 %v4105_v6 }
 0xa8c   :  { %3803 = vmatprep.subr.bf16.mxu1 %v4335_v4 }
 0xa8e   :  { %3800 = vmatmul.mubr.msk.bf16.vlgmr.msra.gmra.mxu1 %vm261_vm3, %v1728_v2 }
 0xa8f   :  { %3805 = vmatprep.mubr.msk.bf16.mxu1 %vm4336_vm2, %v4335_v4 }
 0xb3e   :  { %v1791_v7 = vpop.f32.mrf.mxu1 }
 0xb3f   :  { %v1792_v11 = vadd.f32 %v3408_v8, %v1791_v7 }
 0xb40   :  { %v3785_v9 = vpop.f32.mrf.mxu1 }
 0xb41   :  { %v1990_v32 = vpack.c.bf16 %v1792_v11, %v1792_v11 }
 0xb42   :  { %v1794_v10 = vpop.f32.mrf.mxu1 }
 0xb43   :  { %v1795_v12 = vadd.f32 %v3408_v8, %v1794_v10 }
 0xb44   :  { %v3786_v15 = vpop.f32.mrf.mxu1 }
 0xb45   :  { %v4027_v17 = vpack.i.bf16 %v1795_v12, %v1792_v11  ;;  %v1991_v36 = vpack.c.bf16 %v1795_v12, %v1795_v12 }
 0xb46   :  { %v1857_v18 = vpop.f32.mrf.mxu1 }
 0xb47   :  { %v1858_v19 = vadd.f32 %v3416_v16, %v1857_v18  ;;  %4028 = vrot.lane.b32.xlu0 %v4027_v17, %s4338_s26 }
 0xb48   :  { %v3793_v20 = vpop.f32.mrf.mxu1 }
 0xb49   :  { %v1998_v21 = vpack.c.bf16 %v1858_v19, %v1858_v19 }
 0xb4a   :  { %v1860_v22 = vpop.f32.mrf.mxu1 }
 0xb4b   :  { %v1861_v23 = vadd.f32 %v3416_v16, %v1860_v22  ;;  %v2010_v24 = vsel %vm510_vm4, %v1998_v21, 0 }
 0xb4c   :  { %v3794_v25 = vpop.f32.mrf.mxu1  ;;  %3804 = vmatpush3.bf16.xpose.msra.mxu1 %v2010_v24 }
 0xb4d   :  { %v4042_v26 = vpack.i.bf16 %v1861_v23, %v1858_v19  ;;  %v1999_v27 = vpack.c.bf16 %v1861_v23, %v1861_v23  ;;  %3815 = vmatprep.subr.bf16.mxu1 %v4335_v4 }
 0xb4e   :  { %v1923_v28 = vpop.f32.mrf.mxu1 }
 0xb4f   :  { %4043 = vrot.lane.b32.xlu0 %v4042_v26, %s4339_s2  ;;  %4023 = vrot.lane.b32.xlu1 %v4042_v26, %s4338_s26  ;;  %v2056_v29 = vsel %vm510_vm4, %v1999_v27, 0  ;;  %v4818_v34 = vadd.f32 %v3424_v30, %v1923_v28 }
 0xb50   :  { %v3801_v31 = vpop.f32.mrf.mxu1  ;;  %3810 = vmatpush3.bf16.xpose.msra.mxu0 %v2056_v29 }
 0xb51   :  { %3821 = vmatprep.subr.bf16.mxu0 %v4335_v4  ;;  %v2470_v10 = vpack.c.bf16 %v4818_v34, %v4818_v34 }
 0xb52   :  { %v1926_v33 = vpop.f32.mrf.mxu1 }
 0xb53   :  { %v4820_v35 = vadd.f32 %v3424_v30, %v1926_v33  ;;  %3806 = vmatmul.mubr.msk.bf16.vlgmr.msra.gmra.mxu1 %vm510_vm4, %v1990_v32  ;;  %4033 = vrot.lane.b32.xlu1 %v4042_v26, %s4337_s25  ;;  %v2482_v16 = vsel %vm986_vm5, %v2470_v10, 0 }
 0xb54   :  { %v3802_v37 = vpop.f32.mrf.mxu1  ;;  %3817 = vmatprep.mubr.msk.bf16.mxu1 %vm4336_vm2, %v4335_v4 }
 0xb55   :  { %v4828_v38 = vpack.i.bf16 %v4820_v35, %v4818_v34  ;;  %v2471_v11 = vpack.c.bf16 %v4820_v35, %v4820_v35 }
 0xb57   :  { %4038 = vrot.lane.b32.xlu1 %v4027_v17, %s4337_s25  ;;  %3812 = vmatmul.mubr.msk.bf16.vlgmr.msra.gmra.mxu0 %vm510_vm4, %v1991_v36 }
 0xb58   :  { %3823 = vmatprep.mubr.msk.bf16.mxu0 %vm4336_vm2, %v4335_v4 }
 0xb5b   :  { %4048 = vrot.lane.b32.xlu1 %v4027_v17, %s4339_s2  ;;  %v2528_v17 = vsel %vm986_vm5, %v2471_v11, 0 }
 0xbb9   :  { %v4029_v44 = vpop.permute.xlu0 %4028 }
 0xbba   :  { %v4031_v51 = vunpack.i.h.bf16 %v4029_v44  ;;  %v4030_v14 = vunpack.i.l.bf16 %v4029_v44 }
 0xbbc   :  { %v1993_v54 = vpack.c.bf16 %v4031_v51, %v4031_v51  ;;  %v1992_v55 = vpack.c.bf16 %v4030_v14, %v4030_v14 }
 0xbc1   :  { %v4024_v39 = vpop.permute.xlu1 %4023  ;;  %v4044_v13 = vpop.permute.xlu0 %4043 }
 0xbc2   :  { %v4026_v40 = vunpack.i.h.bf16 %v4024_v39  ;;  %v4025_v41 = vunpack.i.l.bf16 %v4024_v39  ;;  %v4046_v57 = vunpack.i.h.bf16 %v4044_v13  ;;  %v4045_v58 = vunpack.i.l.bf16 %v4044_v13 }
 0xbc4   :  { %v2001_v42 = vpack.c.bf16 %v4026_v40, %v4026_v40  ;;  %v2000_v43 = vpack.c.bf16 %v4025_v41, %v4025_v41  ;;  %v2005_v63 = vpack.c.bf16 %v4046_v57, %v4046_v57  ;;  %v2004_v1 = vpack.c.bf16 %v4045_v58, %v4045_v58 }
 0xbc5   :  { %v4034_v46 = vpop.permute.xlu1 %4033 }
 0xbc6   :  { %v4036_v45 = vunpack.i.h.bf16 %v4034_v46  ;;  %v4035_v47 = vunpack.i.l.bf16 %v4034_v46  ;;  %v2102_v48 = vsel %vm510_vm4, %v2000_v43, 0  ;;  %v2148_v50 = vsel %vm510_vm4, %v2001_v42, 0 }
 0xbc7   :  { %3816 = vmatpush3.bf16.xpose.msra.mxu1 %v2102_v48  ;;  %3822 = vmatpush3.bf16.xpose.msra.mxu0 %v2148_v50  ;;  %v2286_v6 = vsel %vm510_vm4, %v2004_v1, 0  ;;  %v2332_v7 = vsel %vm510_vm4, %v2005_v63, 0 }
 0xbc8   :  { %3827 = vmatprep.subr.bf16.mxu1 %v4335_v4  ;;  %3833 = vmatprep.subr.bf16.mxu0 %v4335_v4  ;;  %v2003_v52 = vpack.c.bf16 %v4036_v45, %v4036_v45  ;;  %v2002_v53 = vpack.c.bf16 %v4035_v47, %v4035_v47 }
 0xbc9   :  { %v4039_v56 = vpop.permute.xlu1 %4038 }
 0xbca   :  { %v2194_v59 = vsel %vm510_vm4, %v2002_v53, 0  ;;  %v2240_v60 = vsel %vm510_vm4, %v2003_v52, 0  ;;  %v4041_v61 = vunpack.i.h.bf16 %v4039_v56  ;;  %v4040_v62 = vunpack.i.l.bf16 %v4039_v56 }
 0xbcc   :  { %v1995_v2 = vpack.c.bf16 %v4041_v61, %v4041_v61  ;;  %v1994_v3 = vpack.c.bf16 %v4040_v62, %v4040_v62 }
 0xbcd   :  { %v4049_v5 = vpop.permute.xlu1 %4048 }
 0xbce   :  { %3818 = vmatmul.mubr.msk.bf16.vlgmr.msra.gmra.mxu1 %vm510_vm4, %v1992_v55  ;;  %3824 = vmatmul.mubr.msk.bf16.vlgmr.msra.gmra.mxu0 %vm510_vm4, %v1993_v54  ;;  %v4051_v8 = vunpack.i.h.bf16 %v4049_v5  ;;  %v4050_v9 = vunpack.i.l.bf16 %v4049_v5 }
 0xbcf   :  { %3828 = vmatpush3.bf16.xpose.msra.mxu1 %v2194_v59  ;;  %3834 = vmatpush3.bf16.xpose.msra.mxu0 %v2240_v60 }
 0xbd0   :  { %3829 = vmatprep.mubr.msk.bf16.mxu1 %vm4336_vm2, %v4335_v4  ;;  %3835 = vmatprep.mubr.msk.bf16.mxu0 %vm4336_vm2, %v4335_v4  ;;  %v1997_v12 = vpack.c.bf16 %v4051_v8, %v4051_v8  ;;  %v1996_v15 = vpack.c.bf16 %v4050_v9, %v4050_v9 }
 0xbd1   :  { %3839 = vmatprep.subr.bf16.mxu1 %v4335_v4  ;;  %3845 = vmatprep.subr.bf16.mxu0 %v4335_v4 }
 0xbd6   :  { %3830 = vmatmul.mubr.msk.bf16.vlgmr.msra.gmra.mxu1 %vm510_vm4, %v1994_v3  ;;  %3836 = vmatmul.mubr.msk.bf16.vlgmr.msra.gmra.mxu0 %vm510_vm4, %v1995_v2 }
 0xbd7   :  { %3840 = vmatpush3.bf16.xpose.msra.mxu1 %v2286_v6  ;;  %3846 = vmatpush3.bf16.xpose.msra.mxu0 %v2332_v7 }
 0xbd8   :  { %3841 = vmatprep.mubr.msk.bf16.mxu1 %vm4336_vm2, %v4335_v4  ;;  %3847 = vmatprep.mubr.msk.bf16.mxu0 %vm4336_vm2, %v4335_v4 }
 0xbd9   :  { %3851 = vmatprep.subr.bf16.mxu1 %v4335_v4  ;;  %3857 = vmatprep.subr.bf16.mxu0 %v4335_v4 }
 0xbde   :  { %3842 = vmatmul.mubr.msk.bf16.vlgmr.msra.gmra.mxu1 %vm510_vm4, %v1996_v15  ;;  %3848 = vmatmul.mubr.msk.bf16.vlgmr.msra.gmra.mxu0 %vm510_vm4, %v1997_v12 }
 0xbdf   :  { %3852 = vmatpush3.bf16.msra.mxu1 %v2482_v16  ;;  %3858 = vmatpush3.bf16.msra.mxu0 %v2528_v17 }
 0xbe0   :  { %3859 = vmatprep.mubr.msk.bf16.mxu0 %vm4336_vm2, %v4335_v4  ;;  %3869 = vmatprep.subr.bf16.mxu0 %v4335_v4 }
 0xbe1   :  { %3853 = vmatprep.mubr.msk.bf16.mxu1 %vm4336_vm2, %v4335_v4  ;;  %3863 = vmatprep.subr.bf16.mxu1 %v4335_v4 }
 0xc13   :  { %v2046_v18 = vpop.f32.mrf.mxu1 }
 0xc14   :  { %v2374_v19 = vsel %vm510_vm4, %v2046_v18, -inf }
 0xc15   :  { %2375 = vmax.xlane.f32.xlu0 %v2374_v19  ;;  %v3807_v20 = vpop.f32.mrf.mxu1 }
 0xc17   :  { %v2049_v21 = vpop.f32.mrf.mxu1  ;;  %v2092_v22 = vpop.f32.mrf.mxu0 }
 0xc18   :  { %v2377_v23 = vsel %vm510_vm4, %v2092_v22, -inf }
 0xc19   :  { %v3808_v24 = vpop.f32.mrf.mxu1  ;;  %2378 = vmax.xlane.f32.xlu1 %v2377_v23  ;;  %v3813_v25 = vpop.f32.mrf.mxu0 }
 0xc1b   :  { %v2095_v26 = vpop.f32.mrf.mxu0 }
 0xc1d   :  { %v3814_v27 = vpop.f32.mrf.mxu0 }
 0xc8e   :  { %v2138_v28 = vpop.f32.mrf.mxu1  ;;  %v2184_v29 = vpop.f32.mrf.mxu0 }
 0xc8f   :  { %v2380_v30 = vsel %vm510_vm4, %v2138_v28, -inf  ;;  %v2383_v35 = vsel %vm510_vm4, %v2184_v29, -inf }
 0xc90   :  { %2381 = vmax.xlane.f32.xlu0 %v2380_v30  ;;  %v3819_v31 = vpop.f32.mrf.mxu1  ;;  %v3825_v32 = vpop.f32.mrf.mxu0 }
 0xc92   :  { %v2141_v33 = vpop.f32.mrf.mxu1  ;;  %v2187_v34 = vpop.f32.mrf.mxu0 }
 0xc94   :  { %v3820_v36 = vpop.f32.mrf.mxu1  ;;  %2384 = vmax.xlane.f32.xlu0 %v2383_v35  ;;  %v3826_v37 = vpop.f32.mrf.mxu0 }
 0xc96   :  { %v2230_v39 = vpop.f32.mrf.mxu1  ;;  %v2276_v40 = vpop.f32.mrf.mxu0 }
 0xc97   :  { %v2386_v41 = vsel %vm510_vm4, %v2230_v39, -inf  ;;  %v2389_v42 = vsel %vm510_vm4, %v2276_v40, -inf }
 0xc98   :  { %v3831_v43 = vpop.f32.mrf.mxu1  ;;  %2387 = vmax.xlane.f32.xlu1 %v2386_v41  ;;  %2390 = vmax.xlane.f32.xlu0 %v2389_v42  ;;  %v3837_v44 = vpop.f32.mrf.mxu0 }
 0xc9a   :  { %v2233_v46 = vpop.f32.mrf.mxu1  ;;  %v2279_v45 = vpop.f32.mrf.mxu0 }
 0xc9c   :  { %v3832_v47 = vpop.f32.mrf.mxu1  ;;  %v3838_v48 = vpop.f32.mrf.mxu0 }
 0xc9e   :  { %v2322_v50 = vpop.f32.mrf.mxu1  ;;  %v2368_v51 = vpop.f32.mrf.mxu0 }
 0xc9f   :  { %v2392_v14 = vsel %vm510_vm4, %v2322_v50, -inf  ;;  %v2395_v53 = vsel %vm510_vm4, %v2368_v51, -inf  ;;  %v2376_v63 = vpop.xlane.xlu0 %2375 }
 0xca0   :  { %v3843_v52 = vpop.f32.mrf.mxu1  ;;  %2393 = vmax.xlane.f32.xlu1 %v2392_v14  ;;  %2396 = vmax.xlane.f32.xlu0 %v2395_v53  ;;  %v3849_v13 = vpop.f32.mrf.mxu0  ;;  %v2398_v1 = vsub.f32 %v2046_v18, %v2376_v63 }
 0xca2   :  { %v2325_v54 = vpop.f32.mrf.mxu1  ;;  %v2379_v55 = vpop.xlane.xlu1 %2378  ;;  %v2406_v2 = vmul.f32 1.442695, %v2398_v1 }
 0xca3   :  { %v2399_v56 = vsub.f32 %v2092_v22, %v2379_v55  ;;  %v2371_v57 = vpop.f32.mrf.mxu0 }
 0xca4   :  { %v3844_v58 = vpop.f32.mrf.mxu1 }
 0xca5   :  { %v2408_v59 = vmul.f32 1.442695, %v2399_v56  ;;  %v3850_v60 = vpop.f32.mrf.mxu0 }
 0xca7   :  { %4158 = vpow2.f32 %v2408_v59 }
 0xca8   :  { %4160 = vpow2.f32 %v2406_v2 }
 0xcb1   :  { %4053 = vrot.lane.b32.xlu1 %v4828_v38, %s4338_s26 }
 0xcb4   :  { %v4159_v61 = vpop.eup %4158 }
 0xcb5   :  { %v2425_v62 = vsel %vm510_vm4, %v4159_v61, 0.0  ;;  %v4884_v3 = vpop.eup %4160 }
 0xcb6   :  { %2426 = vadd.xlane.f32.xlu0 %v2425_v62  ;;  %v2422_v5 = vsel %vm510_vm4, %v4884_v3, 0.0 }
 0xcd5   :  { %2423 = vadd.xlane.f32.xlu1 %v2422_v5 }
 0xd19   :  { %v2382_v6 = vpop.xlane.xlu0 %2381 }
 0xd1a   :  { %v2400_v7 = vsub.f32 %v2138_v28, %v2382_v6 }
 0xd1c   :  { %v2410_v8 = vmul.f32 1.442695, %v2400_v7 }
 0xd1d   :  { %v2385_v9 = vpop.xlane.xlu0 %2384 }
 0xd1e   :  { %4162 = vpow2.f32 %v2410_v8  ;;  %v2401_v10 = vsub.f32 %v2184_v29, %v2385_v9 }
 0xd20   :  { %v2412_v11 = vmul.f32 1.442695, %v2401_v10 }
 0xd21   :  { %v2388_v12 = vpop.xlane.xlu1 %2387  ;;  %v2391_v15 = vpop.xlane.xlu0 %2390 }
 0xd22   :  { %4164 = vpow2.f32 %v2412_v11  ;;  %v2402_v16 = vsub.f32 %v2230_v39, %v2388_v12  ;;  %v2403_v17 = vsub.f32 %v2276_v40, %v2391_v15 }
 0xd24   :  { %v2414_v18 = vmul.f32 1.442695, %v2402_v16  ;;  %v2416_v19 = vmul.f32 1.442695, %v2403_v17 }
 0xd26   :  { %4166 = vpow2.f32 %v2414_v18 }
 0xd27   :  { %4168 = vpow2.f32 %v2416_v19 }
 0xd29   :  { %v2394_v20 = vpop.xlane.xlu1 %2393  ;;  %v2397_v22 = vpop.xlane.xlu0 %2396 }
 0xd2a   :  { %v2404_v21 = vsub.f32 %v2322_v50, %v2394_v20  ;;  %v2405_v24 = vsub.f32 %v2368_v51, %v2397_v22 }
 0xd2b   :  { %v4163_v23 = vpop.eup %4162 }
 0xd2c   :  { %v2418_v25 = vmul.f32 1.442695, %v2404_v21  ;;  %v2428_v26 = vsel %vm510_vm4, %v4163_v23, 0.0  ;;  %v2420_v27 = vmul.f32 1.442695, %v2405_v24 }
 0xd2d   :  { %2429 = vadd.xlane.f32.xlu1 %v2428_v26  ;;  %v4054_v40 = vpop.permute.xlu1 %4053 }
 0xd2e   :  { %4170 = vpow2.f32 %v2418_v25  ;;  %v4056_v41 = vunpack.i.h.bf16 %v4054_v40  ;;  %v4055_v48 = vunpack.i.l.bf16 %v4054_v40 }
 0xd2f   :  { %v4165_v28 = vpop.eup %4164  ;;  %4172 = vpow2.f32 %v2420_v27 }
 0xd30   :  { %v2431_v29 = vsel %vm510_vm4, %v4165_v28, 0.0  ;;  %v2473_v43 = vpack.c.bf16 %v4056_v41, %v4056_v41  ;;  %v2472_v51 = vpack.c.bf16 %v4055_v48, %v4055_v48 }
 0xd31   :  { %2432 = vadd.xlane.f32.xlu0 %v2431_v29 }
 0xd32   :  { %v2620_v45 = vsel %vm986_vm5, %v2473_v43, 0  ;;  %v2574_v53 = vsel %vm986_vm5, %v2472_v51, 0  ;;  %v4106_v43 = vld [vmem:[%s5078_s10 + $0x18] sm:$0xff]  }
 0xd33   :  { %v4890_v30 = vpop.eup %4166 }
 0xd34   :  { %v4892_v31 = vpop.eup %4168  ;;  %v2434_v32 = vsel %vm510_vm4, %v4890_v30, 0.0 }
 0xd35   :  { %2435 = vadd.xlane.f32.xlu1 %v2434_v32  ;;  %v2437_v33 = vsel %vm510_vm4, %v4892_v31, 0.0 }
 0xd36   :  { %2438 = vadd.xlane.f32.xlu0 %v2437_v33 }
 0xd3b   :  { %v4898_v34 = vpop.eup %4170 }
 0xd3c   :  { %v4900_v35 = vpop.eup %4172  ;;  %v2440_v36 = vsel %vm510_vm4, %v4898_v34, 0.0 }
 0xd3d   :  { %2441 = vadd.xlane.f32.xlu1 %v2440_v36  ;;  %v2443_v37 = vsel %vm510_vm4, %v4900_v35, 0.0 }
 0xd3e   :  { %2444 = vadd.xlane.f32.xlu0 %v2443_v37 }
 0xd3f   :  { %v2427_v39 = vpop.xlane.xlu0 %2426 }
 0xd40   :  { %4174 = vrcp.f32 %v2427_v39 }
 0xd4d   :  { %v4175_v42 = vpop.eup %4174 }
 0xd4e   :  { %4063 = vrot.lane.b32.xlu1 %v4828_v38, %s4339_s2  ;;  %v2455_v44 = vmul.f32 %v4175_v42, %v4159_v61 }
 0xd50   :  { %v2463_v46 = vpack.c.bf16 %v2455_v44, %v2455_v44 }
 0xd52   :  { %3860 = vmatmul.mubr.msk.bf16.vlgmr.msra.gmra.mxu0 %vm510_vm4, %v2463_v46 }
 0xd53   :  { %3870 = vmatpush3.bf16.msra.mxu0 %v2620_v45  ;;  %3871 = vmatprep.mubr.msk.bf16.mxu0 %vm4336_vm2, %v4335_v4 }
 0xd54   :  { %4058 = vrot.lane.b32.xlu0 %v4828_v38, %s4337_s25  ;;  %3881 = vmatprep.subr.bf16.mxu0 %v4335_v4 }
 0xd5e   :  { %v2424_v47 = vpop.xlane.xlu1 %2423 }
 0xd5f   :  { %4176 = vrcp.f32 %v2424_v47 }
 0xd6c   :  { %v4177_v50 = vpop.eup %4176 }
 0xd6d   :  { %v2454_v14 = vmul.f32 %v4177_v50, %v4884_v3 }
 0xd6f   :  { %v2462_v52 = vpack.c.bf16 %v2454_v14, %v2454_v14  ;;  %v4107_v14 = vld [vmem:[%s5078_s10 + $0x10] sm:$0xff]  }
 0xd71   :  { %3854 = vmatmul.mubr.msk.bf16.vlgmr.msra.gmra.mxu1 %vm510_vm4, %v2462_v52 }
 0xd72   :  { %3864 = vmatpush3.bf16.msra.mxu1 %v2574_v53  ;;  %3865 = vmatprep.mubr.msk.bf16.mxu1 %vm4336_vm2, %v4335_v4 }
 0xd73   :  { %3875 = vmatprep.subr.bf16.mxu1 %v4335_v4 }
 0xdb6   :  { %v2430_v38 = vpop.xlane.xlu1 %2429 }
 0xdb7   :  { %4178 = vrcp.f32 %v2430_v38 }
 0xdba   :  { %v2433_v13 = vpop.xlane.xlu0 %2432 }
 0xdbb   :  { %4180 = vrcp.f32 %v2433_v13 }
 0xdbe   :  { %v2436_v54 = vpop.xlane.xlu1 %2435 }
 0xdbf   :  { %4182 = vrcp.f32 %v2436_v54  ;;  %v2439_v55 = vpop.xlane.xlu0 %2438 }
 0xdc0   :  { %4184 = vrcp.f32 %v2439_v55 }
 0xdc4   :  { %v4179_v56 = vpop.eup %4178 }
 0xdc5   :  { %v2456_v57 = vmul.f32 %v4179_v56, %v4163_v23 }
 0xdc6   :  { %v2442_v58 = vpop.xlane.xlu1 %2441 }
 0xdc7   :  { %4186 = vrcp.f32 %v2442_v58  ;;  %v2445_v59 = vpop.xlane.xlu0 %2444  ;;  %v2464_v60 = vpack.c.bf16 %v2456_v57, %v2456_v57 }
 0xdc8   :  { %v4181_v61 = vpop.eup %4180  ;;  %4188 = vrcp.f32 %v2445_v59 }
 0xdc9   :  { %3866 = vmatmul.mubr.msk.bf16.vlgmr.msra.gmra.mxu1 %vm510_vm4, %v2464_v60  ;;  %v2457_v62 = vmul.f32 %v4181_v61, %v4165_v28 }
 0xdca   :  { %v4064_v63 = vpop.permute.xlu1 %4063  ;;  %3877 = vmatprep.mubr.msk.bf16.mxu1 %vm4336_vm2, %v4335_v4 }
 0xdcb   :  { %v4059_v1 = vpop.permute.xlu0 %4058  ;;  %v2465_v2 = vpack.c.bf16 %v2457_v62, %v2457_v62  ;;  %v4065_v5 = vunpack.i.l.bf16 %v4064_v63  ;;  %v4066_v9 = vunpack.i.h.bf16 %v4064_v63 }
 0xdcc   :  { %v4183_v3 = vpop.eup %4182  ;;  %v4061_v6 = vunpack.i.h.bf16 %v4059_v1  ;;  %v4060_v7 = vunpack.i.l.bf16 %v4059_v1 }
 0xdcd   :  { %v4185_v8 = vpop.eup %4184  ;;  %3872 = vmatmul.mubr.msk.bf16.vlgmr.msra.gmra.mxu0 %vm510_vm4, %v2465_v2  ;;  %v2458_v12 = vmul.f32 %v4183_v3, %v4890_v30  ;;  %v2476_v16 = vpack.c.bf16 %v4065_v5, %v4065_v5  ;;  %v2477_v19 = vpack.c.bf16 %v4066_v9, %v4066_v9 }
 0xdce   :  { %v2475_v10 = vpack.c.bf16 %v4061_v6, %v4061_v6  ;;  %v2474_v11 = vpack.c.bf16 %v4060_v7, %v4060_v7  ;;  %3883 = vmatprep.mubr.msk.bf16.mxu0 %vm4336_vm2, %v4335_v4  ;;  %v2459_v15 = vmul.f32 %v4185_v8, %v4892_v31 }
 0xdcf   :  { %v2466_v20 = vpack.c.bf16 %v2458_v12, %v2458_v12  ;;  %v2758_v23 = vsel %vm986_vm5, %v2476_v16, 0  ;;  %v2804_v25 = vsel %vm986_vm5, %v2477_v19, 0 }
 0xdd0   :  { %v2666_v17 = vsel %vm986_vm5, %v2474_v11, 0  ;;  %v2712_v18 = vsel %vm986_vm5, %v2475_v10, 0  ;;  %v2467_v21 = vpack.c.bf16 %v2459_v15, %v2459_v15 }
 0xdd1   :  { %3876 = vmatpush3.bf16.msra.mxu1 %v2666_v17  ;;  %3882 = vmatpush3.bf16.msra.mxu0 %v2712_v18 }
 0xdd2   :  { %3887 = vmatprep.subr.bf16.mxu1 %v4335_v4  ;;  %3893 = vmatprep.subr.bf16.mxu0 %v4335_v4 }
 0xdd4   :  { %v4187_v22 = vpop.eup %4186  ;;  %3878 = vmatmul.mubr.msk.bf16.vlgmr.msra.gmra.mxu1 %vm510_vm4, %v2466_v20 }
 0xdd5   :  { %v4189_v24 = vpop.eup %4188  ;;  %3888 = vmatpush3.bf16.msra.mxu1 %v2758_v23  ;;  %3884 = vmatmul.mubr.msk.bf16.vlgmr.msra.gmra.mxu0 %vm510_vm4, %v2467_v21  ;;  %v2460_v26 = vmul.f32 %v4187_v22, %v4898_v34  ;;  %v3449_v22 = vld [vmem:[%s5079_s11 + $0x1] ss:$0 sm:$0xff] }
 0xdd6   :  { %3894 = vmatpush3.bf16.msra.mxu0 %v2804_v25  ;;  %3889 = vmatprep.mubr.msk.bf16.mxu1 %vm4336_vm2, %v4335_v4  ;;  %v2461_v27 = vmul.f32 %v4189_v24, %v4900_v35 }
 0xdd7   :  { %3895 = vmatprep.mubr.msk.bf16.mxu0 %vm4336_vm2, %v4335_v4  ;;  %3899 = vmatprep.subr.bf16.mxu1 %v4335_v4  ;;  %v2468_v28 = vpack.c.bf16 %v2460_v26, %v2460_v26 }
 0xdd8   :  { %3907 = vmatprep.subr.bf16.mxu0 %v4335_v4  ;;  %v2469_v29 = vpack.c.bf16 %v2461_v27, %v2461_v27 }
 0xddc   :  { %3890 = vmatmul.mubr.msk.bf16.vlgmr.msra.gmra.mxu1 %vm510_vm4, %v2468_v28 }
 0xddd   :  { %3896 = vmatmul.mubr.msk.bf16.vlgmr.msra.gmra.mxu0 %vm510_vm4, %v2469_v29  ;;  %3903 = vmatprep.mubr.msk.bf16.mxu1 %vm4336_vm2, %v4335_v4 }
 0xdde   :  { %3911 = vmatprep.mubr.msk.bf16.mxu0 %vm4336_vm2, %v4335_v4  ;;  %3900 = vmatpush3.bf16.msra.mxu1 %v4106_v43  ;;  %v4109_v43 = vld [vmem:[%s5080_s12 + $0x10] sm:$0xff]  }
 0xddf   :  { %3901 = vmatprep.subr.bf16.mxu1 %v4335_v4 }
 0xde2   :  { %3902 = vmatpush3.bf16.msra.mxu1 %v4107_v14 }
 0xde3   :  { %3915 = vmatprep.subr.bf16.mxu1 %v4335_v4 }
 0xe12   :  { %v2564_v30 = vpop.f32.mrf.mxu0 }
 0xe14   :  { %v3861_v31 = vpop.f32.mrf.mxu0 }
 0xe16   :  { %v2567_v32 = vpop.f32.mrf.mxu0 }
 0xe18   :  { %v3862_v33 = vpop.f32.mrf.mxu0 }
 0xe31   :  { %v2518_v34 = vpop.f32.mrf.mxu1 }
 0xe33   :  { %v3855_v35 = vpop.f32.mrf.mxu1 }
 0xe35   :  { %v2521_v36 = vpop.f32.mrf.mxu1 }
 0xe37   :  { %v3856_v37 = vpop.f32.mrf.mxu1 }
 0xe89   :  { %v2610_v39 = vpop.f32.mrf.mxu1 }
 0xe8b   :  { %v3867_v40 = vpop.f32.mrf.mxu1 }
 0xe8d   :  { %v2613_v41 = vpop.f32.mrf.mxu1  ;;  %v2656_v42 = vpop.f32.mrf.mxu0 }
 0xe8e   :  { %v4067_v44 = vpack.i.bf16 %v2656_v42, %v2610_v39 }
 0xe8f   :  { %v3868_v46 = vpop.f32.mrf.mxu1  ;;  %v3873_v45 = vpop.f32.mrf.mxu0 }
 0xe90   :  { %4068 = vrot.lane.b32.xlu1 %v4067_v44, %s4332_s29  ;;  %v4110_v44 = vld [vmem:[%s5082_s14 + $0x78] sm:$0xff]   ;;  %v4111_v46 = vld [vmem:[%s5082_s14 + $0x70] sm:$0xff]   ;;  %v4112_v45 = vld [vmem:[%s5082_s14 + $0x68] sm:$0xff]  }
 0xe91   :  { %v2659_v47 = vpop.f32.mrf.mxu0 }
 0xe92   :  { %v4113_v47 = vld [vmem:[%s5082_s14 + $0x60] sm:$0xff]  }
 0xe93   :  { %v3874_v48 = vpop.f32.mrf.mxu0 }
 0xe94   :  { %v2702_v50 = vpop.f32.mrf.mxu1  ;;  %v4114_v48 = vld [vmem:[%s5082_s14 + $0x58] sm:$0xff]  }
 0xe95   :  { %v2748_v51 = vpop.f32.mrf.mxu0 }
 0xe96   :  { %v3879_v52 = vpop.f32.mrf.mxu1  ;;  %v4072_v53 = vpack.i.bf16 %v2748_v51, %v2702_v50 }
 0xe97   :  { %v3885_v38 = vpop.f32.mrf.mxu0 }
 0xe98   :  { %v2705_v13 = vpop.f32.mrf.mxu1  ;;  %4073 = vrot.lane.b32.xlu0 %v4072_v53, %s5107_s27 }
 0xe99   :  { %v2751_v54 = vpop.f32.mrf.mxu0 }
 0xe9a   :  { %v3880_v55 = vpop.f32.mrf.mxu1 }
 0xe9b   :  { %v3886_v56 = vpop.f32.mrf.mxu0  ;;  %v3455_v55 = vld [vmem:[%s5084_s16 + $0x1] ss:$0 sm:$0xff] }
 0xe9c   :  { %v2794_v57 = vpop.f32.mrf.mxu1 }
 0xe9d   :  { %v2840_v58 = vpop.f32.mrf.mxu0 }
 0xe9e   :  { %v3891_v59 = vpop.f32.mrf.mxu1  ;;  %v4077_v60 = vpack.i.bf16 %v2840_v58, %v2794_v57 }
 0xe9f   :  { %v3897_v61 = vpop.f32.mrf.mxu0  ;;  %v3456_v59 = vld [vmem:[%s5085_s17 + $0x1] ss:$0 sm:$0xff] }
 0xea0   :  { %v2797_v62 = vpop.f32.mrf.mxu1  ;;  %4078 = vrot.lane.b32.xlu1 %v4077_v60, %s4340_s23 }
 0xea1   :  { %v2843_v63 = vpop.f32.mrf.mxu0 }
 0xea2   :  { %v3892_v1 = vpop.f32.mrf.mxu1 }
 0xea3   :  { %v3898_v2 = vpop.f32.mrf.mxu0  ;;  %v4115_v1 = vld [vmem:[%s5082_s14 + $0x50] sm:$0xff]  }
 0xea4   :  { %v4116_v2 = vld [vmem:[%s5082_s14 + $0x48] sm:$0xff]  }
 0xf02   :  { %v4069_v3 = vpop.permute.xlu1 %4068 }
 0xf03   :  { %v4071_v6 = vunpack.i.h.bf16 %v4069_v3  ;;  %v4070_v7 = vunpack.i.l.bf16 %v4069_v3  ;;  %v4117_v3 = vld [vmem:[%s5082_s14 + $0x40] sm:$0xff]  }
 0xf05   :  { %v2871_v11 = vsel %vm510_vm4, %v2564_v30, %v4071_v6  ;;  %v2870_v12 = vsel %vm510_vm4, %v2518_v34, %v4070_v7 }
 0xf0a   :  { %v4074_v5 = vpop.permute.xlu0 %4073 }
 0xf0b   :  { %v4076_v8 = vunpack.i.h.bf16 %v4074_v5  ;;  %v4075_v9 = vunpack.i.l.bf16 %v4074_v5  ;;  %v3462_v5 = vld [vmem:[%s5081_s13 + $0x1] ss:$0 sm:$0xff] }
 0xf0d   :  { %v2873_v17 = vsel %vm1378_vm6, %v2871_v11, %v4076_v8  ;;  %v2872_v18 = vsel %vm1378_vm6, %v2870_v12, %v4075_v9 }
 0xf12   :  { %v4079_v10 = vpop.permute.xlu1 %4078 }
 0xf13   :  { %v4081_v15 = vunpack.i.h.bf16 %v4079_v10  ;;  %v4080_v16 = vunpack.i.l.bf16 %v4079_v10 }
 0xf15   :  { %v2875_v19 = vsel %vm1381_vm7, %v2873_v17, %v4081_v15  ;;  %v2874_v20 = vsel %vm1381_vm7, %v2872_v18, %v4080_v16  ;;  %v3483_v17 = vld [vmem:[%s5083_s15 + $0x1] ss:$0 sm:$0xff] }
 0xf16   :  { %v2876_v21 = vpack.c.bf16 %v2875_v19, %v2874_v20 }
 0xf18   :  { %3904 = vmatmul.mubr.msk.bf16.vlgmr.msra.gmra.mxu1 %vm261_vm3, %v2876_v21 }
 0xf19   :  { %3931 = vmatprep.mubr.msk.bf16.mxu1 %vm4336_vm2, %v4335_v4  ;;  %3916 = vmatpush3.bf16.msra.mxu1 %v4110_v44 }
 0xf1a   :  { %3917 = vmatprep.subr.bf16.mxu1 %v4335_v4 }
 0xf1d   :  { %3918 = vmatpush3.bf16.msra.mxu1 %v4111_v46 }
 0xf1e   :  { %3919 = vmatprep.subr.bf16.mxu1 %v4335_v4 }
 0xf21   :  { %3920 = vmatpush3.bf16.msra.mxu1 %v4112_v45 }
 0xf22   :  { %3921 = vmatprep.subr.bf16.mxu1 %v4335_v4 }
 0xf25   :  { %3922 = vmatpush3.bf16.msra.mxu1 %v4113_v47 }
 0xf26   :  { %3923 = vmatprep.subr.bf16.mxu1 %v4335_v4 }
 0xf29   :  { %3924 = vmatpush3.bf16.msra.mxu1 %v4114_v48  ;;  %v3494_v48 = vld [vmem:[%s5086_s18 + $0x1] ss:$0 sm:$0xff] }
 0xf2a   :  { %3925 = vmatprep.subr.bf16.mxu1 %v4335_v4 }
 0xf2d   :  { %3926 = vmatpush3.bf16.msra.mxu1 %v4115_v1 }
 0xf2e   :  { %3927 = vmatprep.subr.bf16.mxu1 %v4335_v4 }
 0xf31   :  { %3928 = vmatpush3.bf16.msra.mxu1 %v4116_v2 }
 0xf32   :  { %3929 = vmatprep.subr.bf16.mxu1 %v4335_v4 }
 0xf35   :  { %3930 = vmatpush3.bf16.msra.mxu1 %v4117_v3 }
 0xfd8   :  { %v2939_v23 = vpop.f32.mrf.mxu1 }
 0xfd9   :  { %v2940_v24 = vadd.f32 %v3449_v22, %v2939_v23 }
 0xfda   :  { %v3905_v25 = vpop.f32.mrf.mxu1 }
 0xfdb   :  { %v2946_v26 = vadd.f32 %v2940_v24, %v4777_v0 }
 0xfdc   :  { %v2942_v27 = vpop.f32.mrf.mxu1 }
 0xfdd   :  { %v2943_v28 = vadd.f32 %v3449_v22, %v2942_v27  ;;  %v2952_v29 = vsel %vm261_vm3, %v2946_v26, 0.0 }
 0xfde   :  { %2953 = vadd.xlane.f32.xlu0 %v2952_v29  ;;  %v3906_v30 = vpop.f32.mrf.mxu1 }
 0xfdf   :  { %v2947_v31 = vadd.f32 %v2943_v28, %v4779_v49  ;;  %v4108_v49 = vld [vmem:[%s5080_s12 + $0x18] sm:$0xff]  }
 0xfe0   :  { %3908 = vmatpush3.bf16.msra.mxu0 %v4108_v49 }
 0xfe1   :  { %v2955_v32 = vsel %vm261_vm3, %v2947_v31, 0.0  ;;  %3909 = vmatprep.subr.bf16.mxu0 %v4335_v4 }
 0xfe2   :  { %2956 = vadd.xlane.f32.xlu1 %v2955_v32 }
 0xfe4   :  { %3910 = vmatpush3.bf16.msra.mxu0 %v4109_v43 }
 0xfe5   :  { %3935 = vmatprep.subr.mxu0 %v4335_v4 }
0x1067   :  { %v2954_v33 = vpop.xlane.xlu0 %2953 }
0x1068   :  { %v2958_v34 = vmul.f32 0.03125, %v2954_v33 }
0x106a   :  { %v2960_v35 = vsub.f32 %v2946_v26, %v2958_v34 }
0x106b   :  { %v2957_v36 = vpop.xlane.xlu1 %2956 }
0x106c   :  { %v2959_v37 = vmul.f32 0.03125, %v2957_v36  ;;  %v2962_v39 = vmul.f32 %v2960_v35, %v2960_v35 }
0x106e   :  { %v2961_v40 = vsub.f32 %v2947_v31, %v2959_v37  ;;  %v2964_v0 = vsel %vm261_vm3, %v2962_v39, 0.0  ;;  %v3248_v39 = vld [vmem:[%s5088_s20 + $0x18] sm:$0xff] }
0x106f   :  { %2965 = vadd.xlane.f32.xlu0 %v2964_v0  ;;  %v3246_v0 = vld [vmem:[%s5088_s20 + $0x8] sm:$0xff] }
0x1070   :  { %v2963_v41 = vmul.f32 %v2961_v40, %v2961_v40 }
0x1072   :  { %v2967_v42 = vsel %vm261_vm3, %v2963_v41, 0.0  ;;  %v3245_v41 = vld [vmem:[%s5088_s20] sm:$0xff] }
0x1073   :  { %2968 = vadd.xlane.f32.xlu0 %v2967_v42 }
0x10f8   :  { %v2966_v50 = vpop.xlane.xlu0 %2965 }
0x10f9   :  { %v2970_v51 = vmul.f32 0.03125, %v2966_v50 }
0x10fb   :  { %v2972_v14 = vadd.f32 1e-05, %v2970_v51  ;;  %v3495_v51 = vld [vmem:[%s5087_s19 + $0x1] ss:$0 sm:$0xff] }
0x10fc   :  { %v2969_v52 = vpop.xlane.xlu0 %2968 }
0x10fd   :  { %4190 = vrsqrt.f32 %v2972_v14  ;;  %v2971_v53 = vmul.f32 0.03125, %v2969_v52 }
0x10ff   :  { %v2973_v38 = vadd.f32 1e-05, %v2971_v53 }
0x1101   :  { %4192 = vrsqrt.f32 %v2973_v38 }
0x110a   :  { %v4191_v13 = vpop.eup %4190 }
0x110b   :  { %v2976_v54 = vmul.f32 %v4191_v13, %v2960_v35 }
0x110d   :  { %v2984_v58 = vmul.f32 %v3455_v55, %v2976_v54 }
0x110e   :  { %v4193_v56 = vpop.eup %4192 }
0x110f   :  { %v2977_v57 = vmul.f32 %v4193_v56, %v2961_v40  ;;  %v2992_v61 = vadd.f32 %v3456_v59, %v2984_v58  ;;  %v3247_v40 = vld [vmem:[%s5088_s20 + $0x10] sm:$0xff] }
0x1111   :  { %v2985_v60 = vmul.f32 %v3455_v55, %v2977_v57 }
0x1113   :  { %v2993_v62 = vadd.f32 %v3456_v59, %v2985_v60 }
0x1115   :  { %v2994_v63 = vpack.c.bf16 %v2993_v62, %v2992_v61 }
0x1117   :  { %3912 = vmatmul.mubr.msk.bf16.vlgmr.msra.gmra.mxu0 %vm261_vm3, %v2994_v63 }
0x1118   :  { %3943 = vmatprep.mubr.msk.f32.mxu0 %vm4336_vm2, %v4335_v4  ;;  %3936 = vmatpush3.msra.mxu0 %v3248_v39 }
0x1119   :  { %3937 = vmatprep.subr.mxu0 %v4335_v4 }
0x111a   :  { %3938 = vmatpush3.msra.mxu0 %v3247_v40 }
0x111b   :  { %3939 = vmatprep.subr.mxu0 %v4335_v4 }
0x111c   :  { %3940 = vmatpush3.msra.mxu0 %v3246_v0 }
0x111d   :  { %3941 = vmatprep.subr.mxu0 %v4335_v4 }
0x111e   :  { %3942 = vmatpush3.msra.mxu0 %v3245_v41 }
0x11d7   :  { %v3057_v6 = vpop.f32.mrf.mxu0 }
0x11d8   :  { %v3058_v8 = vadd.f32 %v3462_v5, %v3057_v6 }
0x11d9   :  { %v3913_v7 = vpop.f32.mrf.mxu0 }
0x11da   :  { %v3064_v12 = vmax.f32 %v3058_v8, 0.0 }
0x11db   :  { %v3060_v9 = vpop.f32.mrf.mxu0 }
0x11dc   :  { %v3061_v10 = vadd.f32 %v3462_v5, %v3060_v9  ;;  %v3496_v9 = vld [vmem:[%s5089_s21] ss:$0 sm:$0xff] }
0x11dd   :  { %v3914_v11 = vpop.f32.mrf.mxu0 }
0x11de   :  { %v3065_v15 = vmax.f32 %v3061_v10, 0.0 }
0x11e0   :  { %v3066_v16 = vpack.c.bf16 %v3065_v15, %v3064_v12 }
0x11e2   :  { %3932 = vmatmul.mubr.bf16.vlgmr.msra.gmra.mxu1 %v3066_v16 }
0x12a2   :  { %v3174_v18 = vpop.f32.mrf.mxu1 }
0x12a3   :  { %v3175_v19 = vadd.f32 %v3483_v17, %v3174_v18 }
0x12a4   :  { %v3933_v20 = vpop.f32.mrf.mxu1 }
0x12a5   :  { %v3181_v21 = vadd.f32 %v3175_v19, %v2992_v61 }
0x12a6   :  { %v3177_v22 = vpop.f32.mrf.mxu1 }
0x12a7   :  { %v3178_v23 = vadd.f32 %v3483_v17, %v3177_v22  ;;  %v3187_v24 = vsel %vm261_vm3, %v3181_v21, 0.0 }
0x12a8   :  { %3188 = vadd.xlane.f32.xlu1 %v3187_v24  ;;  %v3934_v25 = vpop.f32.mrf.mxu1 }
0x12a9   :  { %v3182_v26 = vadd.f32 %v3178_v23, %v2993_v62 }
0x12ab   :  { %v3190_v27 = vsel %vm261_vm3, %v3182_v26, 0.0 }
0x12ac   :  { %3191 = vadd.xlane.f32.xlu0 %v3190_v27 }
0x1331   :  { %v3189_v28 = vpop.xlane.xlu1 %3188 }
0x1332   :  { %v3193_v29 = vmul.f32 0.03125, %v3189_v28 }
0x1334   :  { %v3195_v30 = vsub.f32 %v3181_v21, %v3193_v29 }
0x1335   :  { %v3192_v31 = vpop.xlane.xlu0 %3191 }
0x1336   :  { %v3194_v32 = vmul.f32 0.03125, %v3192_v31  ;;  %v3197_v33 = vmul.f32 %v3195_v30, %v3195_v30 }
0x1338   :  { %v3196_v34 = vsub.f32 %v3182_v26, %v3194_v32  ;;  %v3199_v35 = vsel %vm261_vm3, %v3197_v33, 0.0 }
0x1339   :  { %3200 = vadd.xlane.f32.xlu1 %v3199_v35 }
0x133a   :  { %v3198_v36 = vmul.f32 %v3196_v34, %v3196_v34 }
0x133c   :  { %v3202_v37 = vsel %vm261_vm3, %v3198_v36, 0.0 }
0x133d   :  { %3203 = vadd.xlane.f32.xlu0 %v3202_v37 }
0x13c2   :  { %v3201_v42 = vpop.xlane.xlu1 %3200 }
0x13c3   :  { %v3205_v49 = vmul.f32 0.03125, %v3201_v42 }
0x13c5   :  { %v3207_v43 = vadd.f32 1e-05, %v3205_v49 }
0x13c6   :  { %v3204_v44 = vpop.xlane.xlu0 %3203 }
0x13c7   :  { %4194 = vrsqrt.f32 %v3207_v43  ;;  %v3206_v46 = vmul.f32 0.03125, %v3204_v44 }
0x13c9   :  { %v3208_v45 = vadd.f32 1e-05, %v3206_v46 }
0x13cb   :  { %4196 = vrsqrt.f32 %v3208_v45 }
0x13d4   :  { %v4195_v47 = vpop.eup %4194 }
0x13d5   :  { %v3211_v50 = vmul.f32 %v4195_v47, %v3195_v30 }
0x13d7   :  { %v3219_v4 = vmul.f32 %v3494_v48, %v3211_v50 }
0x13d8   :  { %v4197_v14 = vpop.eup %4196 }
0x13d9   :  { %v3212_v52 = vmul.f32 %v4197_v14, %v3196_v34  ;;  %v3227_v53 = vadd.f32 %v3495_v51, %v3219_v4 }
0x13db   :  { %v3220_v38 = vmul.f32 %v3494_v48, %v3212_v52  ;;  %v3229_v13 = vsel %vm261_vm3, %v3227_v53, 0.0 }
0x13dc   :  { %v3230_v54 = vrot.slane %v3229_v13, 4 }
0x13dd   :  { %v3228_v55 = vadd.f32 %v3495_v51, %v3220_v38 }
0x13de   :  { %v3231_v56 = vadd.f32 %v3230_v54, %v3229_v13 }
0x13df   :  { %v3236_v57 = vsel %vm261_vm3, %v3228_v55, 0.0 }
0x13e0   :  { %v3232_v58 = vrot.slane %v3231_v56, 2  ;;  %v3237_v59 = vrot.slane %v3236_v57, 4 }
0x13e2   :  { %v3233_v60 = vadd.f32 %v3232_v58, %v3231_v56  ;;  %v3238_v61 = vadd.f32 %v3237_v59, %v3236_v57 }
0x13e4   :  { %v3234_v62 = vrot.slane %v3233_v60, 1  ;;  %v3239_v63 = vrot.slane %v3238_v61, 2 }
0x13e6   :  { %v3240_v1 = vadd.f32 %v3239_v63, %v3238_v61  ;;  %v3235_v2 = vadd.f32 %v3234_v62, %v3233_v60 }
0x13e8   :  { %v3241_v3 = vrot.slane %v3240_v1, 1  ;;  %v3243_v6 = vmul.f32 0.125, %v3235_v2 }
0x13ea   :  { %v3242_v5 = vadd.f32 %v3241_v3, %v3240_v1 }
0x13ec   :  { %v3244_v7 = vmul.f32 0.125, %v3242_v5 }
0x13ee   :  { %v3259_v8 = vsel %vm3258_vm8, %v3244_v7, %v3243_v6 }
0x13ef   :  { %3944 = vmatmul.mubr.msk.f32.vlgmr.msra.gmra.mxu0 %vm261_vm3, %v3259_v8 }
0x14af   :  { %v3328_v10 = vpop.f32.mrf.mxu0 }
0x14b0   :  { %v3329_v11 = vadd.f32 %v3496_v9, %v3328_v10 }
0x14b1   :  { %v3945_v12 = vpop.f32.mrf.mxu0 }
0x14b2   :  { %3332 = vst [vmem:[#allocation11] sm:$0x3] %v3329_v11 }
0x14b3   :  { %4309 = shalt.err (!%p4306_p1)
}
0x14b4   :  { %3342 = dma.vmem_to_hbm [thread:$0]  %s3340_s3, 32, %s5090_s22, [#allocation4]  }
0x14b5   :  { %4324 = dma.done.wait [#allocation4], 32  }
0x14b6   :  { %4325 = vsyncadd [#allocation4], 4294967264 }
0x14b7   :  { %3346 = vsyncpa [#allocation3], 1 }
0x14b8   :  { %3347 = vsyncpa [#allocation6], 1 }
0x14b9   :  { %3348 = vsyncpa [#allocation9], 1 }
0x14ba   :  { %3349 = vsyncpa [#allocation4], 1 }

</bundles_post_ra>
